<compile_context>
chip_gen: v7x
topology: tpu7x:2x2x1
jax: 0.10.0
libtpu: 0.0.40
codegen_flags: <defaults>
</compile_context>

<pallas_src>
import functools
import math

import jax
import jax.numpy as jnp
from jax import lax
from jax.experimental import pallas as pl
from jax.experimental.pallas import tpu as pltpu

PAD = 0          # constants.PAD
LN_EPS = 1e-5    # nn.LayerNorm default


def _round_up(x, m):
    return (x + m - 1) // m * m


# ---------------------------------------------------------------------------
# Generation-aware constants (v7x has 64 MiB VMEM per TensorCore).
# ---------------------------------------------------------------------------
def _vmem_capacity_bytes():
    try:
        info = pltpu.get_tpu_info()
        return int(getattr(info, "vmem_capacity_bytes", 128 * 1024 * 1024))
    except Exception:
        return 128 * 1024 * 1024


_VMEM_CAP = _vmem_capacity_bytes()
if _VMEM_CAP <= 64 * 1024 * 1024:            # v7x-class
    VMEM_LIMIT_BYTES = 32 * 1024 * 1024
    TM_NOM, TN_NOM, TK_NOM = 256, 256, 256
    TQ_NOM, TKV_NOM = 128, 256
    LN_ROWS_NOM = 256
else:                                         # v5e / v6e (128 MiB VMEM)
    VMEM_LIMIT_BYTES = 48 * 1024 * 1024
    TM_NOM, TN_NOM, TK_NOM = 512, 256, 512
    TQ_NOM, TKV_NOM = 256, 512
    LN_ROWS_NOM = 512


# ---------------------------------------------------------------------------
# Tile selection helpers
# ---------------------------------------------------------------------------
def _choose_m_tile(m, nominal=None):
    """Sublane-axis tile: 16-aligned (bf16 packing); M is padded to a multiple."""
    nominal = TM_NOM if nominal is None else nominal
    tm = min(nominal, _round_up(m, 16))
    return tm, _round_up(m, tm)


def _choose_lane_tile(dim, nominal):
    """Lane-axis tile: full dim (always legal) or a multiple of 128.
    Returns (tile, padded_dim); padded_dim > dim means zero-padding is needed."""
    if dim <= nominal:
        return dim, dim
    t = (nominal // 128) * 128
    while t > 128 and dim % t != 0:
        t -= 128
    if dim % t == 0:
        return t, dim
    return 128, _round_up(dim, 128)


def _choose_seq_tile(t_len, nominal):
    """Sequence tile: a divisor of T that is a multiple of 8 (KV is never padded,
    so the tile must divide T exactly); falls back to full T."""
    if t_len <= nominal:
        return t_len
    t = (nominal // 8) * 8
    while t >= 8:
        if t_len % t == 0:
            return t
        t -= 8
    return t_len


# ---------------------------------------------------------------------------
# Pallas kernels
# ---------------------------------------------------------------------------
def _matmul_bias_kernel(x_ref, w_ref, b_ref, o_ref, acc_ref, *, relu):
    # grid = (M/tm, N/tn, K/tk); k is the reduction axis ("arbitrary").
    @pl.when(pl.program_id(2) == 0)
    def _():
        acc_ref[...] = jnp.zeros_like(acc_ref)

    acc_ref[...] += jnp.dot(x_ref[...], w_ref[...],
                            preferred_element_type=jnp.float32)

    @pl.when(pl.program_id(2) == pl.num_programs(2) - 1)
    def _():
        out = acc_ref[...] + b_ref[...].astype(jnp.float32)
        if relu:
            out = jnp.maximum(out, 0.0)
        o_ref[...] = out.astype(o_ref.dtype)


def _matmul_bias_add_ln_kernel(x_ref, w_ref, b_ref, r_ref, g_ref, bb_ref,
                               o_ref, acc_ref, *, eps):
    # grid = (M/tm, K/tk); tn == N so the epilogue holds the full row and can
    # fuse residual-add + LayerNorm (one-pass stats: var = E[x^2] - mu^2).
    @pl.when(pl.program_id(1) == 0)
    def _():
        acc_ref[...] = jnp.zeros_like(acc_ref)

    acc_ref[...] += jnp.dot(x_ref[...], w_ref[...],
                            preferred_element_type=jnp.float32)

    @pl.when(pl.program_id(1) == pl.num_programs(1) - 1)
    def _():
        y = (acc_ref[...] + b_ref[...].astype(jnp.float32)
             + r_ref[...].astype(jnp.float32))
        mu = jnp.mean(y, axis=-1, keepdims=True)
        mu2 = jnp.mean(y * y, axis=-1, keepdims=True)
        var = jnp.maximum(mu2 - mu * mu, 0.0)
        yn = (y - mu) * lax.rsqrt(var + eps)
        o_ref[...] = (yn * g_ref[...] + bb_ref[...]).astype(o_ref.dtype)


def _add_ln_kernel(x_ref, r_ref, g_ref, b_ref, o_ref, *, eps):
    # Fallback standalone residual-add + LayerNorm (only used when N is too
    # wide for the fused matmul epilogue).
    x = x_ref[...].astype(jnp.float32) + r_ref[...].astype(jnp.float32)
    mu = jnp.mean(x, axis=-1, keepdims=True)
    mu2 = jnp.mean(x * x, axis=-1, keepdims=True)
    var = jnp.maximum(mu2 - mu * mu, 0.0)
    y = (x - mu) * lax.rsqrt(var + eps)
    o_ref[...] = (y * g_ref[...] + b_ref[...]).astype(o_ref.dtype)


def _flash_attn_kernel(q_ref, kv_ref, o_ref, m_sc, l_sc, acc_sc, *, n_heads):
    # grid = (B, T/tq, T/tkv); kv axis is the online-softmax reduction.
    # q block: (1, tq, H) bf16; kv block: (1, tkv, 2H) bf16 packed [K | V].
    ki = pl.program_id(2)

    @pl.when(ki == 0)
    def _():
        m_sc[...] = jnp.full_like(m_sc, -jnp.inf)
        l_sc[...] = jnp.zeros_like(l_sc)
        acc_sc[...] = jnp.zeros_like(acc_sc)

    q_all = q_ref[0]                      # (tq, H)   bf16
    kv = kv_ref[0]                        # (tkv, 2H) bf16
    hidden = q_all.shape[1]
    dh = hidden // n_heads
    scale = 1.0 / math.sqrt(dh)

    for h in range(n_heads):
        # scale folded into the (tq, dh) Q tile (f32) before the bf16 MXU cast
        q = (q_all[:, h * dh:(h + 1) * dh].astype(jnp.float32)
             * scale).astype(jnp.bfloat16)
        k = kv[:, h * dh:(h + 1) * dh]
        v = kv[:, hidden + h * dh:hidden + (h + 1) * dh]

        s = lax.dot_general(q, k, (((1,), (1,)), ((), ())),
                            preferred_element_type=jnp.float32)   # (tq, tkv)
        m_prev = m_sc[h]                                          # (tq, 1)
        m_new = jnp.maximum(m_prev, jnp.max(s, axis=-1, keepdims=True))
        alpha = jnp.exp(m_prev - m_new)
        p = jnp.exp(s - m_new)                                    # unnormalized
        l_sc[h] = alpha * l_sc[h] + jnp.sum(p, axis=-1, keepdims=True)
        acc_sc[h] = alpha * acc_sc[h] + jnp.dot(
            p.astype(jnp.bfloat16), v, preferred_element_type=jnp.float32)
        m_sc[h] = m_new

    @pl.when(ki == pl.num_programs(2) - 1)
    def _():
        for h in range(n_heads):
            inv = pl.reciprocal(l_sc[h], approx=True)
            o_ref[0, :, h * dh:(h + 1) * dh] = (acc_sc[h] * inv).astype(o_ref.dtype)


# ---------------------------------------------------------------------------
# Pallas wrappers
# ---------------------------------------------------------------------------
def pallas_linear(x2d, w, b, *, relu=False, out_dtype=jnp.bfloat16):
    M, K = x2d.shape
    K2, N = w.shape
    assert K == K2

    tm, Mp = _choose_m_tile(M)
    tk, Kp = _choose_lane_tile(K, TK_NOM)
    tn, Np = _choose_lane_tile(N, TN_NOM)

    xb = x2d.astype(jnp.bfloat16)
    wb = w.astype(jnp.bfloat16)
    if Mp != M or Kp != K:
        xb = jnp.pad(xb, ((0, Mp - M), (0, Kp - K)))
    if Kp != K or Np != N:
        wb = jnp.pad(wb, ((0, Kp - K), (0, Np - N)))
    b2 = b.astype(jnp.float32).reshape(1, N)
    if Np != N:
        b2 = jnp.pad(b2, ((0, 0), (0, Np - N)))

    kern = functools.partial(_matmul_bias_kernel, relu=relu)
    out = pl.pallas_call(
        kern,
        out_shape=jax.ShapeDtypeStruct((Mp, Np), out_dtype),
        grid=(Mp // tm, Np // tn, Kp // tk),
        in_specs=[
            pl.BlockSpec((tm, tk), lambda i, j, k: (i, k)),
            pl.BlockSpec((tk, tn), lambda i, j, k: (k, j)),
            pl.BlockSpec((1, tn), lambda i, j, k: (0, j)),
        ],
        out_specs=pl.BlockSpec((tm, tn), lambda i, j, k: (i, j)),
        scratch_shapes=[pltpu.VMEM((tm, tn), jnp.float32)],
        compiler_params=pltpu.CompilerParams(
            dimension_semantics=("parallel", "parallel", "arbitrary"),
            vmem_limit_bytes=VMEM_LIMIT_BYTES),
    )(xb, wb, b2)
    if Mp != M or Np != N:
        out = out[:M, :N]
    return out


def _fused_vmem_ok(tm, tk, n, out_itemsize):
    acc = tm * n * 4
    dbuf = 2 * (tm * tk * 2            # x (bf16)
                + tk * n * 2           # w (bf16)
                + tm * n * 2           # residual (bf16)
                + tm * n * out_itemsize
                + 3 * n * 4)           # bias / gamma / beta (f32)
    return acc + dbuf <= int(0.70 * VMEM_LIMIT_BYTES)


def pallas_add_layernorm(residual, y2d, gamma, beta, *, out_dtype):
    # Fallback only (fused epilogue handles the common case).
    M, H = residual.shape
    tm, Mp = _choose_m_tile(M, LN_ROWS_NOM)
    r = residual.astype(jnp.bfloat16)
    y = y2d.astype(jnp.bfloat16)
    if Mp != M:
        r = jnp.pad(r, ((0, Mp - M), (0, 0)))
        y = jnp.pad(y, ((0, Mp - M), (0, 0)))
    out = pl.pallas_call(
        functools.partial(_add_ln_kernel, eps=LN_EPS),
        out_shape=jax.ShapeDtypeStruct((Mp, H), out_dtype),
        grid=(Mp // tm,),
        in_specs=[
            pl.BlockSpec((tm, H), lambda i: (i, 0)),
            pl.BlockSpec((tm, H), lambda i: (i, 0)),
            pl.BlockSpec((1, H), lambda i: (0, 0)),
            pl.BlockSpec((1, H), lambda i: (0, 0)),
        ],
        out_specs=pl.BlockSpec((tm, H), lambda i: (i, 0)),
        compiler_params=pltpu.CompilerParams(
            dimension_semantics=("parallel",),
            vmem_limit_bytes=VMEM_LIMIT_BYTES),
    )(y, r, gamma.astype(jnp.float32).reshape(1, H),
      beta.astype(jnp.float32).reshape(1, H))
    return out[:M] if Mp != M else out


def pallas_linear_add_ln(x2d, w, b, residual, gamma, beta, *,
                         out_dtype=jnp.bfloat16):
    """out = LayerNorm(residual + x2d @ w + b), LN fused into the matmul epilogue."""
    M, K = x2d.shape
    K2, N = w.shape
    assert K == K2 and residual.shape == (M, N)
    out_itemsize = jnp.dtype(out_dtype).itemsize

    tm, _ = _choose_m_tile(M)
    tk, _ = _choose_lane_tile(K, TK_NOM)
    while not _fused_vmem_ok(tm, tk, N, out_itemsize) and tk > 128 and tk % 128 == 0:
        tk -= 128
    while not _fused_vmem_ok(tm, tk, N, out_itemsize) and tm > 16:
        tm = max(16, tm // 2)
    if not _fused_vmem_ok(tm, tk, N, out_itemsize):
        # N too wide for a single-row epilogue: fall back to two passes.
        y = pallas_linear(x2d, w, b, out_dtype=jnp.bfloat16)
        return pallas_add_layernorm(residual, y, gamma, beta, out_dtype=out_dtype)

    Mp = _round_up(M, tm)
    Kp = _round_up(K, tk)

    xb = x2d.astype(jnp.bfloat16)
    wb = w.astype(jnp.bfloat16)
    rb = residual.astype(jnp.bfloat16)
    if Mp != M or Kp != K:
        xb = jnp.pad(xb, ((0, Mp - M), (0, Kp - K)))
    if Kp != K:
        wb = jnp.pad(wb, ((0, Kp - K), (0, 0)))
    if Mp != M:
        rb = jnp.pad(rb, ((0, Mp - M), (0, 0)))

    kern = functools.partial(_matmul_bias_add_ln_kernel, eps=LN_EPS)
    out = pl.pallas_call(
        kern,
        out_shape=jax.ShapeDtypeStruct((Mp, N), out_dtype),
        grid=(Mp // tm, Kp // tk),
        in_specs=[
            pl.BlockSpec((tm, tk), lambda i, k: (i, k)),
            pl.BlockSpec((tk, N), lambda i, k: (k, 0)),
            pl.BlockSpec((1, N), lambda i, k: (0, 0)),
            pl.BlockSpec((tm, N), lambda i, k: (i, 0)),
            pl.BlockSpec((1, N), lambda i, k: (0, 0)),
            pl.BlockSpec((1, N), lambda i, k: (0, 0)),
        ],
        out_specs=pl.BlockSpec((tm, N), lambda i, k: (i, 0)),
        scratch_shapes=[pltpu.VMEM((tm, N), jnp.float32)],
        compiler_params=pltpu.CompilerParams(
            dimension_semantics=("parallel", "arbitrary"),
            vmem_limit_bytes=VMEM_LIMIT_BYTES),
    )(xb, wb, b.astype(jnp.float32).reshape(1, N), rb,
      gamma.astype(jnp.float32).reshape(1, N),
      beta.astype(jnp.float32).reshape(1, N))
    return out[:M] if Mp != M else out


def pallas_flash_attention(q, kv, n_heads):
    # q: (B, T, H) bf16; kv: (B, T, 2H) bf16 packed [K | V]; out: (B, T, H) bf16.
    B, T, H = q.shape
    assert kv.shape == (B, T, 2 * H) and H % n_heads == 0
    dh = H // n_heads
    tq = _choose_seq_tile(T, TQ_NOM)
    tkv = _choose_seq_tile(T, TKV_NOM)

    kern = functools.partial(_flash_attn_kernel, n_heads=n_heads)
    return pl.pallas_call(
        kern,
        out_shape=jax.ShapeDtypeStruct((B, T, H), jnp.bfloat16),
        grid=(B, T // tq, T // tkv),
        in_specs=[
            pl.BlockSpec((1, tq, H), lambda b, qi, ki: (b, qi, 0)),
            pl.BlockSpec((1, tkv, 2 * H), lambda b, qi, ki: (b, ki, 0)),
        ],
        out_specs=pl.BlockSpec((1, tq, H), lambda b, qi, ki: (b, qi, 0)),
        scratch_shapes=[
            pltpu.VMEM((n_heads, tq, 1), jnp.float32),   # running max
            pltpu.VMEM((n_heads, tq, 1), jnp.float32),   # running sum
            pltpu.VMEM((n_heads, tq, dh), jnp.float32),  # running output
        ],
        compiler_params=pltpu.CompilerParams(
            dimension_semantics=("parallel", "parallel", "arbitrary"),
            vmem_limit_bytes=VMEM_LIMIT_BYTES),
    )(q, kv)


# ---------------------------------------------------------------------------
# Model (glue in plain JAX, hot paths in Pallas)
# ---------------------------------------------------------------------------
def encoder_layer(x2d, lp, B, T, H, n_heads, out_dtype):
    # Q and packed-KV projections (bf16 activations, f32 accumulation).
    q = pallas_linear(x2d, lp["wq"], lp["bq"]).reshape(B, T, H)
    kv = pallas_linear(x2d, lp["wkv"], lp["bkv"]).reshape(B, T, 2 * H)

    attn = pallas_flash_attention(q, kv, n_heads).reshape(-1, H)
    # out-proj with fused residual-add + LayerNorm epilogue
    x2d = pallas_linear_add_ln(attn, lp["wo"], lp["bo"], residual=x2d,
                               gamma=lp["ln1_g"], beta=lp["ln1_b"],
                               out_dtype=jnp.bfloat16)

    # FFN: Linear -> ReLU -> (Linear + fused residual/LN)
    h = pallas_linear(x2d, lp["w1"], lp["b1"], relu=True)
    x2d = pallas_linear_add_ln(h, lp["w2"], lp["b2"], residual=x2d,
                               gamma=lp["ln2_g"], beta=lp["ln2_b"],
                               out_dtype=out_dtype)
    return x2d


def encoder_forward(params, input_ids, n_heads):
    # nn.Embedding lookup (padding_idx row zeroed in the table).
    # TODO(synk): token-id gather kept in XLA; a Pallas version needs manual DMA gather.
    x = params["embed"][input_ids]                    # (B, T, H) f32
    B, T, H = x.shape
    x2d = x.reshape(-1, H).astype(jnp.bfloat16)       # bf16 residual stream
    n_layers = len(params["layers"])
    for li, lp in enumerate(params["layers"]):
        final = li == n_layers - 1
        x2d = encoder_layer(x2d, lp, B, T, H, n_heads,
                            out_dtype=jnp.float32 if final else jnp.bfloat16)
    return x2d.reshape(B, T, H)


# ---------------------------------------------------------------------------
# Deterministic parameter init
# ---------------------------------------------------------------------------
def init_params(key, vocab_size, hidden_size, ff_size, n_layers):
    def nrm(k, shape):
        return (0.02 * jax.random.normal(k, shape)).astype(jnp.float32)

    keys = jax.random.split(key, 1 + n_layers)
    embed = nrm(keys[0], (vocab_size, hidden_size))
    embed = embed.at[PAD].set(0.0)                    # padding_idx

    H = hidden_size
    layers = []
    for li in range(n_layers):
        ks = jax.random.split(keys[1 + li], 5)
        layers.append({
            "wq": nrm(ks[0], (H, H)), "bq": jnp.zeros((H,), jnp.float32),
            "wkv": nrm(ks[1], (H, 2 * H)), "bkv": jnp.zeros((2 * H,), jnp.float32),
            "wo": nrm(ks[2], (H, H)), "bo": jnp.zeros((H,), jnp.float32),
            "w1": nrm(ks[3], (H, ff_size)), "b1": jnp.zeros((ff_size,), jnp.float32),
            "w2": nrm(ks[4], (ff_size, H)), "b2": jnp.zeros((H,), jnp.float32),
            "ln1_g": jnp.ones((H,), jnp.float32), "ln1_b": jnp.zeros((H,), jnp.float32),
            "ln2_g": jnp.ones((H,), jnp.float32), "ln2_b": jnp.zeros((H,), jnp.float32),
        })
    return {"embed": embed, "layers": layers}


# ---------------------------------------------------------------------------
if __name__ == "__main__":
    vocab_size = 64
    hidden_size = 32
    ff_size = 64
    n_layers = 2
    n_heads = 4
    batch = 2
    seq_len = 8

    key = jax.random.PRNGKey(0)
    k_par, k_ids = jax.random.split(key, 2)

    params = init_params(k_par, vocab_size, hidden_size, ff_size, n_layers)
    input_ids = jax.random.randint(k_ids, (batch, seq_len), 0, vocab_size,
                                   dtype=jnp.int32)

    fwd = jax.jit(functools.partial(encoder_forward, n_heads=n_heads))
    out = fwd(params, input_ids)
    jax.block_until_ready(out)

    assert out.shape == (batch, seq_len, hidden_size), out.shape
    assert bool(jnp.all(jnp.isfinite(out)))
    print("KERNEL_OK")
</pallas_src>

<mosaic_0001>
module attributes {stable_mosaic.version = 11 : i64} {
  func.func @_matmul_bias_add_ln_kernel(%arg0: i32, %arg1: i32, %arg2: memref<16x32xbf16, #tpu.memory_space<vmem>>, %arg3: memref<32x32xbf16, #tpu.memory_space<vmem>>, %arg4: memref<1x32xf32, #tpu.memory_space<vmem>>, %arg5: memref<16x32xbf16, #tpu.memory_space<vmem>>, %arg6: memref<1x32xf32, #tpu.memory_space<vmem>>, %arg7: memref<1x32xf32, #tpu.memory_space<vmem>>, %arg8: memref<16x32xbf16, #tpu.memory_space<vmem>>, %arg9: memref<16x32xf32, #tpu.memory_space<vmem>>) attributes {dimension_semantics = [#tpu.dimension_semantics<parallel>, #tpu.dimension_semantics<arbitrary>], iteration_bounds = array<i64: 1, 1>, scalar_prefetch = 0 : i64, scratch_operands = 1 : i64, tpu.core_type = #tpu.core_type<tc>, window_params = [{transform_indices = @transform_0, window_bounds = array<i64: 16, 32>}, {transform_indices = @transform_1, window_bounds = array<i64: 32, 32>}, {pipeline_mode = #tpu.pipeline_mode<synchronous>, transform_indices = @transform_2, window_bounds = array<i64: 1, 32>}, {transform_indices = @transform_3, window_bounds = array<i64: 16, 32>}, {pipeline_mode = #tpu.pipeline_mode<synchronous>, transform_indices = @transform_4, window_bounds = array<i64: 1, 32>}, {pipeline_mode = #tpu.pipeline_mode<synchronous>, transform_indices = @transform_5, window_bounds = array<i64: 1, 32>}, {transform_indices = @transform_6, window_bounds = array<i64: 16, 32>}]} {
    %c0_i32 = arith.constant 0 : i32
    %0 = arith.cmpi eq, %arg1, %c0_i32 : i32
    %1 = arith.extui %0 : i1 to i32
    %c0_i32_0 = arith.constant 0 : i32
    %2 = arith.cmpi ne, %1, %c0_i32_0 : i32
    scf.if %2 {
      %cst_10 = arith.constant 0.000000e+00 : f32
      %12 = vector.broadcast %cst_10 : f32 to vector<16x32xf32>
      %c0_11 = arith.constant 0 : index
      %c0_12 = arith.constant 0 : index
      %13 = vector.load %arg9[%c0_11, %c0_12] : memref<16x32xf32, #tpu.memory_space<vmem>>, vector<16x32xf32>
      tpu.vector_store %arg9[%c0_11, %c0_12], %12 {strides = array<i32>} : memref<16x32xf32, #tpu.memory_space<vmem>>, vector<16x32xf32>,
    } else {
    }
    %c0 = arith.constant 0 : index
    %c0_1 = arith.constant 0 : index
    %3 = vector.load %arg9[%c0, %c0_1] : memref<16x32xf32, #tpu.memory_space<vmem>>, vector<16x32xf32>
    %c0_2 = arith.constant 0 : index
    %c0_3 = arith.constant 0 : index
    %4 = vector.load %arg2[%c0_2, %c0_3] : memref<16x32xbf16, #tpu.memory_space<vmem>>, vector<16x32xbf16>
    %c0_4 = arith.constant 0 : index
    %c0_5 = arith.constant 0 : index
    %5 = vector.load %arg3[%c0_4, %c0_5] : memref<32x32xbf16, #tpu.memory_space<vmem>>, vector<32x32xbf16>
    %cst = arith.constant dense<0.000000e+00> : vector<16x32xf32>
    %6 = tpu.matmul %4, %5, %cst {dimension_numbers = #tpu.dot_dimension_numbers<[1], [0], [0], [1], [0, 0, 1, 1], [], []>} : vector<16x32xbf16>, vector<32x32xbf16>, vector<16x32xf32> -> vector<16x32xf32>
    %7 = arith.addf %3, %6 : vector<16x32xf32>
    %c0_6 = arith.constant 0 : index
    %c0_7 = arith.constant 0 : index
    %8 = vector.load %arg9[%c0_6, %c0_7] : memref<16x32xf32, #tpu.memory_space<vmem>>, vector<16x32xf32>
    tpu.vector_store %arg9[%c0_6, %c0_7], %7 {strides = array<i32>} : memref<16x32xf32, #tpu.memory_space<vmem>>, vector<16x32xf32>,
    %c0_i32_8 = arith.constant 0 : i32
    %9 = arith.cmpi eq, %arg1, %c0_i32_8 : i32
    %10 = arith.extui %9 : i1 to i32
    %c0_i32_9 = arith.constant 0 : i32
    %11 = arith.cmpi ne, %10, %c0_i32_9 : i32
    scf.if %11 {
      %c0_10 = arith.constant 0 : index
      %c0_11 = arith.constant 0 : index
      %12 = vector.load %arg9[%c0_10, %c0_11] : memref<16x32xf32, #tpu.memory_space<vmem>>, vector<16x32xf32>
      %c0_12 = arith.constant 0 : index
      %c0_13 = arith.constant 0 : index
      %13 = vector.load %arg4[%c0_12, %c0_13] : memref<1x32xf32, #tpu.memory_space<vmem>>, vector<1x32xf32>
      %14 = vector.broadcast %13 : vector<1x32xf32> to vector<16x32xf32>
      %15 = arith.addf %12, %14 : vector<16x32xf32>
      %c0_14 = arith.constant 0 : index
      %c0_15 = arith.constant 0 : index
      %16 = vector.load %arg5[%c0_14, %c0_15] : memref<16x32xbf16, #tpu.memory_space<vmem>>, vector<16x32xbf16>
      %17 = arith.extf %16 : vector<16x32xbf16> to vector<16x32xf32>
      %18 = arith.addf %15, %17 : vector<16x32xf32>
      %cst_16 = arith.constant dense<0.000000e+00> : vector<16xf32>
      %19 = vector.multi_reduction <add>, %18, %cst_16 [1] : vector<16x32xf32> to vector<16xf32>
      %20 = vector.shape_cast %19 : vector<16xf32> to vector<16x1xf32>
      %cst_17 = arith.constant 3.200000e+01 : f32
      %21 = vector.broadcast %cst_17 : f32 to vector<16x1xf32>
      %22 = arith.divf %20, %21 : vector<16x1xf32>
      %23 = arith.mulf %18, %18 : vector<16x32xf32>
      %cst_18 = arith.constant dense<0.000000e+00> : vector<16xf32>
      %24 = vector.multi_reduction <add>, %23, %cst_18 [1] : vector<16x32xf32> to vector<16xf32>
      %25 = vector.shape_cast %24 : vector<16xf32> to vector<16x1xf32>
      %cst_19 = arith.constant 3.200000e+01 : f32
      %26 = vector.broadcast %cst_19 : f32 to vector<16x1xf32>
      %27 = arith.divf %25, %26 : vector<16x1xf32>
      %28 = arith.mulf %22, %22 : vector<16x1xf32>
      %29 = arith.subf %27, %28 : vector<16x1xf32>
      %cst_20 = arith.constant 0.000000e+00 : f32
      %30 = vector.broadcast %cst_20 : f32 to vector<16x1xf32>
      %31 = arith.maximumf %29, %30 : vector<16x1xf32>
      %32 = vector.broadcast %22 : vector<16x1xf32> to vector<16x32xf32>
      %33 = arith.subf %18, %32 : vector<16x32xf32>
      %cst_21 = arith.constant 9.99999974E-6 : f32
      %34 = vector.broadcast %cst_21 : f32 to vector<16x1xf32>
      %35 = arith.addf %31, %34 : vector<16x1xf32>
      %36 = math.rsqrt %35 : vector<16x1xf32>
      %37 = vector.broadcast %36 : vector<16x1xf32> to vector<16x32xf32>
      %38 = arith.mulf %33, %37 : vector<16x32xf32>
      %c0_22 = arith.constant 0 : index
      %c0_23 = arith.constant 0 : index
      %39 = vector.load %arg6[%c0_22, %c0_23] : memref<1x32xf32, #tpu.memory_space<vmem>>, vector<1x32xf32>
      %40 = vector.broadcast %39 : vector<1x32xf32> to vector<16x32xf32>
      %41 = arith.mulf %38, %40 : vector<16x32xf32>
      %c0_24 = arith.constant 0 : index
      %c0_25 = arith.constant 0 : index
      %42 = vector.load %arg7[%c0_24, %c0_25] : memref<1x32xf32, #tpu.memory_space<vmem>>, vector<1x32xf32>
      %43 = vector.broadcast %42 : vector<1x32xf32> to vector<16x32xf32>
      %44 = arith.addf %41, %43 : vector<16x32xf32>
      %45 = arith.truncf %44 : vector<16x32xf32> to vector<16x32xbf16>
      %c0_26 = arith.constant 0 : index
      %c0_27 = arith.constant 0 : index
      %46 = vector.load %arg8[%c0_26, %c0_27] : memref<16x32xbf16, #tpu.memory_space<vmem>>, vector<16x32xbf16>
      tpu.vector_store %arg8[%c0_26, %c0_27], %45 {strides = array<i32>} : memref<16x32xbf16, #tpu.memory_space<vmem>>, vector<16x32xbf16>,
    } else {
    }
    return
  }
  func.func @transform_0(%arg0: i32, %arg1: i32) -> (i32, i32) {
    %c0_i32 = arith.constant 0 : i32
    return %arg0, %arg1 : i32, i32
  }
  func.func @transform_1(%arg0: i32, %arg1: i32) -> (i32, i32) {
    %c0_i32 = arith.constant 0 : i32
    %c0_i32_0 = arith.constant 0 : i32
    return %arg1, %c0_i32 : i32, i32
  }
  func.func @transform_2(%arg0: i32, %arg1: i32) -> (i32, i32) {
    %c0_i32 = arith.constant 0 : i32
    %c0_i32_0 = arith.constant 0 : i32
    %c0_i32_1 = arith.constant 0 : i32
    return %c0_i32, %c0_i32_0 : i32, i32
  }
  func.func @transform_3(%arg0: i32, %arg1: i32) -> (i32, i32) {
    %c0_i32 = arith.constant 0 : i32
    %c0_i32_0 = arith.constant 0 : i32
    return %arg0, %c0_i32 : i32, i32
  }
  func.func @transform_4(%arg0: i32, %arg1: i32) -> (i32, i32) {
    %c0_i32 = arith.constant 0 : i32
    %c0_i32_0 = arith.constant 0 : i32
    %c0_i32_1 = arith.constant 0 : i32
    return %c0_i32, %c0_i32_0 : i32, i32
  }
  func.func @transform_5(%arg0: i32, %arg1: i32) -> (i32, i32) {
    %c0_i32 = arith.constant 0 : i32
    %c0_i32_0 = arith.constant 0 : i32
    %c0_i32_1 = arith.constant 0 : i32
    return %c0_i32, %c0_i32_0 : i32, i32
  }
  func.func @transform_6(%arg0: i32, %arg1: i32) -> (i32, i32) {
    %c0_i32 = arith.constant 0 : i32
    %c0_i32_0 = arith.constant 0 : i32
    return %arg0, %c0_i32 : i32, i32
  }
}

module attributes {stable_mosaic.version = 11 : i64} {
  func.func @_matmul_bias_kernel(%arg0: i32, %arg1: i32, %arg2: i32, %arg3: memref<16x32xbf16, #tpu.memory_space<vmem>>, %arg4: memref<32x32xbf16, #tpu.memory_space<vmem>>, %arg5: memref<1x32xf32, #tpu.memory_space<vmem>>, %arg6: memref<16x32xbf16, #tpu.memory_space<vmem>>, %arg7: memref<16x32xf32, #tpu.memory_space<vmem>>) attributes {dimension_semantics = [#tpu.dimension_semantics<parallel>, #tpu.dimension_semantics<parallel>, #tpu.dimension_semantics<arbitrary>], iteration_bounds = array<i64: 1, 1, 1>, scalar_prefetch = 0 : i64, scratch_operands = 1 : i64, tpu.core_type = #tpu.core_type<tc>, window_params = [{transform_indices = @transform_0, window_bounds = array<i64: 16, 32>}, {transform_indices = @transform_1, window_bounds = array<i64: 32, 32>}, {transform_indices = @transform_2, window_bounds = array<i64: 1, 32>}, {transform_indices = @transform_3, window_bounds = array<i64: 16, 32>}]} {
    %c0_i32 = arith.constant 0 : i32
    %0 = arith.cmpi eq, %arg2, %c0_i32 : i32
    %1 = arith.extui %0 : i1 to i32
    %c0_i32_0 = arith.constant 0 : i32
    %2 = arith.cmpi ne, %1, %c0_i32_0 : i32
    scf.if %2 {
      %cst_10 = arith.constant 0.000000e+00 : f32
      %12 = vector.broadcast %cst_10 : f32 to vector<16x32xf32>
      %c0_11 = arith.constant 0 : index
      %c0_12 = arith.constant 0 : index
      %13 = vector.load %arg7[%c0_11, %c0_12] : memref<16x32xf32, #tpu.memory_space<vmem>>, vector<16x32xf32>
      tpu.vector_store %arg7[%c0_11, %c0_12], %12 {strides = array<i32>} : memref<16x32xf32, #tpu.memory_space<vmem>>, vector<16x32xf32>,
    } else {
    }
    %c0 = arith.constant 0 : index
    %c0_1 = arith.constant 0 : index
    %3 = vector.load %arg7[%c0, %c0_1] : memref<16x32xf32, #tpu.memory_space<vmem>>, vector<16x32xf32>
    %c0_2 = arith.constant 0 : index
    %c0_3 = arith.constant 0 : index
    %4 = vector.load %arg3[%c0_2, %c0_3] : memref<16x32xbf16, #tpu.memory_space<vmem>>, vector<16x32xbf16>
    %c0_4 = arith.constant 0 : index
    %c0_5 = arith.constant 0 : index
    %5 = vector.load %arg4[%c0_4, %c0_5] : memref<32x32xbf16, #tpu.memory_space<vmem>>, vector<32x32xbf16>
    %cst = arith.constant dense<0.000000e+00> : vector<16x32xf32>
    %6 = tpu.matmul %4, %5, %cst {dimension_numbers = #tpu.dot_dimension_numbers<[1], [0], [0], [1], [0, 0, 1, 1], [], []>} : vector<16x32xbf16>, vector<32x32xbf16>, vector<16x32xf32> -> vector<16x32xf32>
    %7 = arith.addf %3, %6 : vector<16x32xf32>
    %c0_6 = arith.constant 0 : index
    %c0_7 = arith.constant 0 : index
    %8 = vector.load %arg7[%c0_6, %c0_7] : memref<16x32xf32, #tpu.memory_space<vmem>>, vector<16x32xf32>
    tpu.vector_store %arg7[%c0_6, %c0_7], %7 {strides = array<i32>} : memref<16x32xf32, #tpu.memory_space<vmem>>, vector<16x32xf32>,
    %c0_i32_8 = arith.constant 0 : i32
    %9 = arith.cmpi eq, %arg2, %c0_i32_8 : i32
    %10 = arith.extui %9 : i1 to i32
    %c0_i32_9 = arith.constant 0 : i32
    %11 = arith.cmpi ne, %10, %c0_i32_9 : i32
    scf.if %11 {
      %c0_10 = arith.constant 0 : index
      %c0_11 = arith.constant 0 : index
      %12 = vector.load %arg7[%c0_10, %c0_11] : memref<16x32xf32, #tpu.memory_space<vmem>>, vector<16x32xf32>
      %c0_12 = arith.constant 0 : index
      %c0_13 = arith.constant 0 : index
      %13 = vector.load %arg5[%c0_12, %c0_13] : memref<1x32xf32, #tpu.memory_space<vmem>>, vector<1x32xf32>
      %14 = vector.broadcast %13 : vector<1x32xf32> to vector<16x32xf32>
      %15 = arith.addf %12, %14 : vector<16x32xf32>
      %16 = arith.truncf %15 : vector<16x32xf32> to vector<16x32xbf16>
      %c0_14 = arith.constant 0 : index
      %c0_15 = arith.constant 0 : index
      %17 = vector.load %arg6[%c0_14, %c0_15] : memref<16x32xbf16, #tpu.memory_space<vmem>>, vector<16x32xbf16>
      tpu.vector_store %arg6[%c0_14, %c0_15], %16 {strides = array<i32>} : memref<16x32xbf16, #tpu.memory_space<vmem>>, vector<16x32xbf16>,
    } else {
    }
    return
  }
  func.func @transform_0(%arg0: i32, %arg1: i32, %arg2: i32) -> (i32, i32) {
    %c0_i32 = arith.constant 0 : i32
    return %arg0, %arg2 : i32, i32
  }
  func.func @transform_1(%arg0: i32, %arg1: i32, %arg2: i32) -> (i32, i32) {
    %c0_i32 = arith.constant 0 : i32
    return %arg2, %arg1 : i32, i32
  }
  func.func @transform_2(%arg0: i32, %arg1: i32, %arg2: i32) -> (i32, i32) {
    %c0_i32 = arith.constant 0 : i32
    %c0_i32_0 = arith.constant 0 : i32
    return %c0_i32, %arg1 : i32, i32
  }
  func.func @transform_3(%arg0: i32, %arg1: i32, %arg2: i32) -> (i32, i32) {
    %c0_i32 = arith.constant 0 : i32
    return %arg0, %arg1 : i32, i32
  }
}

module attributes {stable_mosaic.version = 11 : i64} {
  func.func @_matmul_bias_kernel(%arg0: i32, %arg1: i32, %arg2: i32, %arg3: memref<16x32xbf16, #tpu.memory_space<vmem>>, %arg4: memref<32x64xbf16, #tpu.memory_space<vmem>>, %arg5: memref<1x64xf32, #tpu.memory_space<vmem>>, %arg6: memref<16x64xbf16, #tpu.memory_space<vmem>>, %arg7: memref<16x64xf32, #tpu.memory_space<vmem>>) attributes {dimension_semantics = [#tpu.dimension_semantics<parallel>, #tpu.dimension_semantics<parallel>, #tpu.dimension_semantics<arbitrary>], iteration_bounds = array<i64: 1, 1, 1>, scalar_prefetch = 0 : i64, scratch_operands = 1 : i64, tpu.core_type = #tpu.core_type<tc>, window_params = [{transform_indices = @transform_0, window_bounds = array<i64: 16, 32>}, {transform_indices = @transform_1, window_bounds = array<i64: 32, 64>}, {transform_indices = @transform_2, window_bounds = array<i64: 1, 64>}, {transform_indices = @transform_3, window_bounds = array<i64: 16, 64>}]} {
    %c0_i32 = arith.constant 0 : i32
    %0 = arith.cmpi eq, %arg2, %c0_i32 : i32
    %1 = arith.extui %0 : i1 to i32
    %c0_i32_0 = arith.constant 0 : i32
    %2 = arith.cmpi ne, %1, %c0_i32_0 : i32
    scf.if %2 {
      %cst_10 = arith.constant 0.000000e+00 : f32
      %12 = vector.broadcast %cst_10 : f32 to vector<16x64xf32>
      %c0_11 = arith.constant 0 : index
      %c0_12 = arith.constant 0 : index
      %13 = vector.load %arg7[%c0_11, %c0_12] : memref<16x64xf32, #tpu.memory_space<vmem>>, vector<16x64xf32>
      tpu.vector_store %arg7[%c0_11, %c0_12], %12 {strides = array<i32>} : memref<16x64xf32, #tpu.memory_space<vmem>>, vector<16x64xf32>,
    } else {
    }
    %c0 = arith.constant 0 : index
    %c0_1 = arith.constant 0 : index
    %3 = vector.load %arg7[%c0, %c0_1] : memref<16x64xf32, #tpu.memory_space<vmem>>, vector<16x64xf32>
    %c0_2 = arith.constant 0 : index
    %c0_3 = arith.constant 0 : index
    %4 = vector.load %arg3[%c0_2, %c0_3] : memref<16x32xbf16, #tpu.memory_space<vmem>>, vector<16x32xbf16>
    %c0_4 = arith.constant 0 : index
    %c0_5 = arith.constant 0 : index
    %5 = vector.load %arg4[%c0_4, %c0_5] : memref<32x64xbf16, #tpu.memory_space<vmem>>, vector<32x64xbf16>
    %cst = arith.constant dense<0.000000e+00> : vector<16x64xf32>
    %6 = tpu.matmul %4, %5, %cst {dimension_numbers = #tpu.dot_dimension_numbers<[1], [0], [0], [1], [0, 0, 1, 1], [], []>} : vector<16x32xbf16>, vector<32x64xbf16>, vector<16x64xf32> -> vector<16x64xf32>
    %7 = arith.addf %3, %6 : vector<16x64xf32>
    %c0_6 = arith.constant 0 : index
    %c0_7 = arith.constant 0 : index
    %8 = vector.load %arg7[%c0_6, %c0_7] : memref<16x64xf32, #tpu.memory_space<vmem>>, vector<16x64xf32>
    tpu.vector_store %arg7[%c0_6, %c0_7], %7 {strides = array<i32>} : memref<16x64xf32, #tpu.memory_space<vmem>>, vector<16x64xf32>,
    %c0_i32_8 = arith.constant 0 : i32
    %9 = arith.cmpi eq, %arg2, %c0_i32_8 : i32
    %10 = arith.extui %9 : i1 to i32
    %c0_i32_9 = arith.constant 0 : i32
    %11 = arith.cmpi ne, %10, %c0_i32_9 : i32
    scf.if %11 {
      %c0_10 = arith.constant 0 : index
      %c0_11 = arith.constant 0 : index
      %12 = vector.load %arg7[%c0_10, %c0_11] : memref<16x64xf32, #tpu.memory_space<vmem>>, vector<16x64xf32>
      %c0_12 = arith.constant 0 : index
      %c0_13 = arith.constant 0 : index
      %13 = vector.load %arg5[%c0_12, %c0_13] : memref<1x64xf32, #tpu.memory_space<vmem>>, vector<1x64xf32>
      %14 = vector.broadcast %13 : vector<1x64xf32> to vector<16x64xf32>
      %15 = arith.addf %12, %14 : vector<16x64xf32>
      %16 = arith.truncf %15 : vector<16x64xf32> to vector<16x64xbf16>
      %c0_14 = arith.constant 0 : index
      %c0_15 = arith.constant 0 : index
      %17 = vector.load %arg6[%c0_14, %c0_15] : memref<16x64xbf16, #tpu.memory_space<vmem>>, vector<16x64xbf16>
      tpu.vector_store %arg6[%c0_14, %c0_15], %16 {strides = array<i32>} : memref<16x64xbf16, #tpu.memory_space<vmem>>, vector<16x64xbf16>,
    } else {
    }
    return
  }
  func.func @transform_0(%arg0: i32, %arg1: i32, %arg2: i32) -> (i32, i32) {
    %c0_i32 = arith.constant 0 : i32
    return %arg0, %arg2 : i32, i32
  }
  func.func @transform_1(%arg0: i32, %arg1: i32, %arg2: i32) -> (i32, i32) {
    %c0_i32 = arith.constant 0 : i32
    return %arg2, %arg1 : i32, i32
  }
  func.func @transform_2(%arg0: i32, %arg1: i32, %arg2: i32) -> (i32, i32) {
    %c0_i32 = arith.constant 0 : i32
    %c0_i32_0 = arith.constant 0 : i32
    return %c0_i32, %arg1 : i32, i32
  }
  func.func @transform_3(%arg0: i32, %arg1: i32, %arg2: i32) -> (i32, i32) {
    %c0_i32 = arith.constant 0 : i32
    return %arg0, %arg1 : i32, i32
  }
}

module attributes {stable_mosaic.version = 11 : i64} {
  func.func @_flash_attn_kernel(%arg0: i32, %arg1: i32, %arg2: i32, %arg3: memref<1x8x32xbf16, #tpu.memory_space<vmem>>, %arg4: memref<1x8x64xbf16, #tpu.memory_space<vmem>>, %arg5: memref<1x8x32xbf16, #tpu.memory_space<vmem>>, %arg6: memref<4x8x1xf32, #tpu.memory_space<vmem>>, %arg7: memref<4x8x1xf32, #tpu.memory_space<vmem>>, %arg8: memref<4x8x8xf32, #tpu.memory_space<vmem>>) attributes {dimension_semantics = [#tpu.dimension_semantics<parallel>, #tpu.dimension_semantics<parallel>, #tpu.dimension_semantics<arbitrary>], iteration_bounds = array<i64: 2, 1, 1>, scalar_prefetch = 0 : i64, scratch_operands = 3 : i64, tpu.core_type = #tpu.core_type<tc>, window_params = [{transform_indices = @transform_0, window_bounds = array<i64: 1, 8, 32>}, {transform_indices = @transform_1, window_bounds = array<i64: 1, 8, 64>}, {transform_indices = @transform_2, window_bounds = array<i64: 1, 8, 32>}]} {
    %c0_i32 = arith.constant 0 : i32
    %0 = arith.cmpi eq, %arg2, %c0_i32 : i32
    %1 = arith.extui %0 : i1 to i32
    %c0_i32_0 = arith.constant 0 : i32
    %2 = arith.cmpi ne, %1, %c0_i32_0 : i32
    scf.if %2 {
      %cst_96 = arith.constant 0xFF800000 : f32
      %170 = vector.broadcast %cst_96 : f32 to vector<4x8x1xf32>
      %c0_97 = arith.constant 0 : index
      %c0_98 = arith.constant 0 : index
      %c0_99 = arith.constant 0 : index
      %171 = vector.load %arg6[%c0_97, %c0_98, %c0_99] : memref<4x8x1xf32, #tpu.memory_space<vmem>>, vector<4x8x1xf32>
      tpu.vector_store %arg6[%c0_97, %c0_98, %c0_99], %170 {strides = array<i32>} : memref<4x8x1xf32, #tpu.memory_space<vmem>>, vector<4x8x1xf32>,
      %cst_100 = arith.constant 0.000000e+00 : f32
      %172 = vector.broadcast %cst_100 : f32 to vector<4x8x1xf32>
      %c0_101 = arith.constant 0 : index
      %c0_102 = arith.constant 0 : index
      %c0_103 = arith.constant 0 : index
      %173 = vector.load %arg7[%c0_101, %c0_102, %c0_103] : memref<4x8x1xf32, #tpu.memory_space<vmem>>, vector<4x8x1xf32>
      tpu.vector_store %arg7[%c0_101, %c0_102, %c0_103], %172 {strides = array<i32>} : memref<4x8x1xf32, #tpu.memory_space<vmem>>, vector<4x8x1xf32>,
      %cst_104 = arith.constant 0.000000e+00 : f32
      %174 = vector.broadcast %cst_104 : f32 to vector<4x8x8xf32>
      %c0_105 = arith.constant 0 : index
      %c0_106 = arith.constant 0 : index
      %c0_107 = arith.constant 0 : index
      %175 = vector.load %arg8[%c0_105, %c0_106, %c0_107] : memref<4x8x8xf32, #tpu.memory_space<vmem>>, vector<4x8x8xf32>
      tpu.vector_store %arg8[%c0_105, %c0_106, %c0_107], %174 {strides = array<i32>} : memref<4x8x8xf32, #tpu.memory_space<vmem>>, vector<4x8x8xf32>,
    } else {
    }
    %c0 = arith.constant 0 : index
    %c0_1 = arith.constant 0 : index
    %c0_2 = arith.constant 0 : index
    %3 = vector.load %arg3[%c0, %c0_1, %c0_2] : memref<1x8x32xbf16, #tpu.memory_space<vmem>>, vector<1x8x32xbf16>
    %4 = vector.shape_cast %3 : vector<1x8x32xbf16> to vector<8x32xbf16>
    %c0_3 = arith.constant 0 : index
    %c0_4 = arith.constant 0 : index
    %c0_5 = arith.constant 0 : index
    %5 = vector.load %arg4[%c0_3, %c0_4, %c0_5] : memref<1x8x64xbf16, #tpu.memory_space<vmem>>, vector<1x8x64xbf16>
    %6 = vector.shape_cast %5 : vector<1x8x64xbf16> to vector<8x64xbf16>
    %7 = vector.extract_strided_slice %4 {offsets = [0, 0], sizes = [8, 8], strides = [1, 1]} : vector<8x32xbf16> to vector<8x8xbf16>
    %8 = arith.extf %7 : vector<8x8xbf16> to vector<8x8xf32>
    %cst = arith.constant 0.353553385 : f32
    %9 = vector.broadcast %cst : f32 to vector<8x8xf32>
    %10 = arith.mulf %8, %9 : vector<8x8xf32>
    %11 = arith.truncf %10 : vector<8x8xf32> to vector<8x8xbf16>
    %12 = vector.extract_strided_slice %6 {offsets = [0, 0], sizes = [8, 8], strides = [1, 1]} : vector<8x64xbf16> to vector<8x8xbf16>
    %13 = vector.extract_strided_slice %6 {offsets = [0, 32], sizes = [8, 8], strides = [1, 1]} : vector<8x64xbf16> to vector<8x8xbf16>
    %cst_6 = arith.constant dense<0.000000e+00> : vector<8x8xf32>
    %14 = tpu.matmul %11, %12, %cst_6 {dimension_numbers = #tpu.dot_dimension_numbers<[1], [1], [0], [0], [0, 0, 1, 0], [], []>} : vector<8x8xbf16>, vector<8x8xbf16>, vector<8x8xf32> -> vector<8x8xf32>
    %c0_7 = arith.constant 0 : index
    %c0_8 = arith.constant 0 : index
    %c0_9 = arith.constant 0 : index
    %15 = vector.load %arg6[%c0_7, %c0_8, %c0_9] : memref<4x8x1xf32, #tpu.memory_space<vmem>>, vector<1x8x1xf32>
    %16 = vector.shape_cast %15 : vector<1x8x1xf32> to vector<8x1xf32>
    %cst_10 = arith.constant dense<0xFF800000> : vector<8xf32>
    %17 = vector.multi_reduction <maximumf>, %14, %cst_10 [1] : vector<8x8xf32> to vector<8xf32>
    %18 = vector.shape_cast %17 : vector<8xf32> to vector<8x1xf32>
    %19 = arith.maximumf %16, %18 : vector<8x1xf32>
    %20 = arith.subf %16, %19 : vector<8x1xf32>
    %21 = math.exp %20 : vector<8x1xf32>
    %22 = vector.broadcast %19 : vector<8x1xf32> to vector<8x8xf32>
    %23 = arith.subf %14, %22 : vector<8x8xf32>
    %24 = math.exp %23 : vector<8x8xf32>
    %c0_11 = arith.constant 0 : index
    %c0_12 = arith.constant 0 : index
    %c0_13 = arith.constant 0 : index
    %25 = vector.load %arg7[%c0_11, %c0_12, %c0_13] : memref<4x8x1xf32, #tpu.memory_space<vmem>>, vector<1x8x1xf32>
    %26 = vector.shape_cast %25 : vector<1x8x1xf32> to vector<8x1xf32>
    %27 = arith.mulf %21, %26 : vector<8x1xf32>
    %cst_14 = arith.constant dense<0.000000e+00> : vector<8xf32>
    %28 = vector.multi_reduction <add>, %24, %cst_14 [1] : vector<8x8xf32> to vector<8xf32>
    %29 = vector.shape_cast %28 : vector<8xf32> to vector<8x1xf32>
    %30 = arith.addf %27, %29 : vector<8x1xf32>
    %c0_15 = arith.constant 0 : index
    %c0_16 = arith.constant 0 : index
    %c0_17 = arith.constant 0 : index
    %31 = vector.load %arg7[%c0_15, %c0_16, %c0_17] : memref<4x8x1xf32, #tpu.memory_space<vmem>>, vector<1x8x1xf32>
    %32 = vector.shape_cast %31 : vector<1x8x1xf32> to vector<8x1xf32>
    %33 = vector.shape_cast %30 : vector<8x1xf32> to vector<1x8x1xf32>
    tpu.vector_store %arg7[%c0_15, %c0_16, %c0_17], %33 {strides = array<i32>} : memref<4x8x1xf32, #tpu.memory_space<vmem>>, vector<1x8x1xf32>,
    %c0_18 = arith.constant 0 : index
    %c0_19 = arith.constant 0 : index
    %c0_20 = arith.constant 0 : index
    %34 = vector.load %arg8[%c0_18, %c0_19, %c0_20] : memref<4x8x8xf32, #tpu.memory_space<vmem>>, vector<1x8x8xf32>
    %35 = vector.shape_cast %34 : vector<1x8x8xf32> to vector<8x8xf32>
    %36 = vector.broadcast %21 : vector<8x1xf32> to vector<8x8xf32>
    %37 = arith.mulf %36, %35 : vector<8x8xf32>
    %38 = arith.truncf %24 : vector<8x8xf32> to vector<8x8xbf16>
    %cst_21 = arith.constant dense<0.000000e+00> : vector<8x8xf32>
    %39 = tpu.matmul %38, %13, %cst_21 {dimension_numbers = #tpu.dot_dimension_numbers<[1], [0], [0], [1], [0, 0, 1, 1], [], []>} : vector<8x8xbf16>, vector<8x8xbf16>, vector<8x8xf32> -> vector<8x8xf32>
    %40 = arith.addf %37, %39 : vector<8x8xf32>
    %c0_22 = arith.constant 0 : index
    %c0_23 = arith.constant 0 : index
    %c0_24 = arith.constant 0 : index
    %41 = vector.load %arg8[%c0_22, %c0_23, %c0_24] : memref<4x8x8xf32, #tpu.memory_space<vmem>>, vector<1x8x8xf32>
    %42 = vector.shape_cast %41 : vector<1x8x8xf32> to vector<8x8xf32>
    %43 = vector.shape_cast %40 : vector<8x8xf32> to vector<1x8x8xf32>
    tpu.vector_store %arg8[%c0_22, %c0_23, %c0_24], %43 {strides = array<i32>} : memref<4x8x8xf32, #tpu.memory_space<vmem>>, vector<1x8x8xf32>,
    %c0_25 = arith.constant 0 : index
    %c0_26 = arith.constant 0 : index
    %c0_27 = arith.constant 0 : index
    %44 = vector.load %arg6[%c0_25, %c0_26, %c0_27] : memref<4x8x1xf32, #tpu.memory_space<vmem>>, vector<1x8x1xf32>
    %45 = vector.shape_cast %44 : vector<1x8x1xf32> to vector<8x1xf32>
    %46 = vector.shape_cast %19 : vector<8x1xf32> to vector<1x8x1xf32>
    tpu.vector_store %arg6[%c0_25, %c0_26, %c0_27], %46 {strides = array<i32>} : memref<4x8x1xf32, #tpu.memory_space<vmem>>, vector<1x8x1xf32>,
    %47 = vector.extract_strided_slice %4 {offsets = [0, 8], sizes = [8, 8], strides = [1, 1]} : vector<8x32xbf16> to vector<8x8xbf16>
    %48 = arith.extf %47 : vector<8x8xbf16> to vector<8x8xf32>
    %cst_28 = arith.constant 0.353553385 : f32
    %49 = vector.broadcast %cst_28 : f32 to vector<8x8xf32>
    %50 = arith.mulf %48, %49 : vector<8x8xf32>
    %51 = arith.truncf %50 : vector<8x8xf32> to vector<8x8xbf16>
    %52 = vector.extract_strided_slice %6 {offsets = [0, 8], sizes = [8, 8], strides = [1, 1]} : vector<8x64xbf16> to vector<8x8xbf16>
    %53 = vector.extract_strided_slice %6 {offsets = [0, 40], sizes = [8, 8], strides = [1, 1]} : vector<8x64xbf16> to vector<8x8xbf16>
    %cst_29 = arith.constant dense<0.000000e+00> : vector<8x8xf32>
    %54 = tpu.matmul %51, %52, %cst_29 {dimension_numbers = #tpu.dot_dimension_numbers<[1], [1], [0], [0], [0, 0, 1, 0], [], []>} : vector<8x8xbf16>, vector<8x8xbf16>, vector<8x8xf32> -> vector<8x8xf32>
    %c1 = arith.constant 1 : index
    %c0_30 = arith.constant 0 : index
    %c0_31 = arith.constant 0 : index
    %55 = vector.load %arg6[%c1, %c0_30, %c0_31] : memref<4x8x1xf32, #tpu.memory_space<vmem>>, vector<1x8x1xf32>
    %56 = vector.shape_cast %55 : vector<1x8x1xf32> to vector<8x1xf32>
    %cst_32 = arith.constant dense<0xFF800000> : vector<8xf32>
    %57 = vector.multi_reduction <maximumf>, %54, %cst_32 [1] : vector<8x8xf32> to vector<8xf32>
    %58 = vector.shape_cast %57 : vector<8xf32> to vector<8x1xf32>
    %59 = arith.maximumf %56, %58 : vector<8x1xf32>
    %60 = arith.subf %56, %59 : vector<8x1xf32>
    %61 = math.exp %60 : vector<8x1xf32>
    %62 = vector.broadcast %59 : vector<8x1xf32> to vector<8x8xf32>
    %63 = arith.subf %54, %62 : vector<8x8xf32>
    %64 = math.exp %63 : vector<8x8xf32>
    %c1_33 = arith.constant 1 : index
    %c0_34 = arith.constant 0 : index
    %c0_35 = arith.constant 0 : index
    %65 = vector.load %arg7[%c1_33, %c0_34, %c0_35] : memref<4x8x1xf32, #tpu.memory_space<vmem>>, vector<1x8x1xf32>
    %66 = vector.shape_cast %65 : vector<1x8x1xf32> to vector<8x1xf32>
    %67 = arith.mulf %61, %66 : vector<8x1xf32>
    %cst_36 = arith.constant dense<0.000000e+00> : vector<8xf32>
    %68 = vector.multi_reduction <add>, %64, %cst_36 [1] : vector<8x8xf32> to vector<8xf32>
    %69 = vector.shape_cast %68 : vector<8xf32> to vector<8x1xf32>
    %70 = arith.addf %67, %69 : vector<8x1xf32>
    %c1_37 = arith.constant 1 : index
    %c0_38 = arith.constant 0 : index
    %c0_39 = arith.constant 0 : index
    %71 = vector.load %arg7[%c1_37, %c0_38, %c0_39] : memref<4x8x1xf32, #tpu.memory_space<vmem>>, vector<1x8x1xf32>
    %72 = vector.shape_cast %71 : vector<1x8x1xf32> to vector<8x1xf32>
    %73 = vector.shape_cast %70 : vector<8x1xf32> to vector<1x8x1xf32>
    tpu.vector_store %arg7[%c1_37, %c0_38, %c0_39], %73 {strides = array<i32>} : memref<4x8x1xf32, #tpu.memory_space<vmem>>, vector<1x8x1xf32>,
    %c1_40 = arith.constant 1 : index
    %c0_41 = arith.constant 0 : index
    %c0_42 = arith.constant 0 : index
    %74 = vector.load %arg8[%c1_40, %c0_41, %c0_42] : memref<4x8x8xf32, #tpu.memory_space<vmem>>, vector<1x8x8xf32>
    %75 = vector.shape_cast %74 : vector<1x8x8xf32> to vector<8x8xf32>
    %76 = vector.broadcast %61 : vector<8x1xf32> to vector<8x8xf32>
    %77 = arith.mulf %76, %75 : vector<8x8xf32>
    %78 = arith.truncf %64 : vector<8x8xf32> to vector<8x8xbf16>
    %cst_43 = arith.constant dense<0.000000e+00> : vector<8x8xf32>
    %79 = tpu.matmul %78, %53, %cst_43 {dimension_numbers = #tpu.dot_dimension_numbers<[1], [0], [0], [1], [0, 0, 1, 1], [], []>} : vector<8x8xbf16>, vector<8x8xbf16>, vector<8x8xf32> -> vector<8x8xf32>
    %80 = arith.addf %77, %79 : vector<8x8xf32>
    %c1_44 = arith.constant 1 : index
    %c0_45 = arith.constant 0 : index
    %c0_46 = arith.constant 0 : index
    %81 = vector.load %arg8[%c1_44, %c0_45, %c0_46] : memref<4x8x8xf32, #tpu.memory_space<vmem>>, vector<1x8x8xf32>
    %82 = vector.shape_cast %81 : vector<1x8x8xf32> to vector<8x8xf32>
    %83 = vector.shape_cast %80 : vector<8x8xf32> to vector<1x8x8xf32>
    tpu.vector_store %arg8[%c1_44, %c0_45, %c0_46], %83 {strides = array<i32>} : memref<4x8x8xf32, #tpu.memory_space<vmem>>, vector<1x8x8xf32>,
    %c1_47 = arith.constant 1 : index
    %c0_48 = arith.constant 0 : index
    %c0_49 = arith.constant 0 : index
    %84 = vector.load %arg6[%c1_47, %c0_48, %c0_49] : memref<4x8x1xf32, #tpu.memory_space<vmem>>, vector<1x8x1xf32>
    %85 = vector.shape_cast %84 : vector<1x8x1xf32> to vector<8x1xf32>
    %86 = vector.shape_cast %59 : vector<8x1xf32> to vector<1x8x1xf32>
    tpu.vector_store %arg6[%c1_47, %c0_48, %c0_49], %86 {strides = array<i32>} : memref<4x8x1xf32, #tpu.memory_space<vmem>>, vector<1x8x1xf32>,
    %87 = vector.extract_strided_slice %4 {offsets = [0, 16], sizes = [8, 8], strides = [1, 1]} : vector<8x32xbf16> to vector<8x8xbf16>
    %88 = arith.extf %87 : vector<8x8xbf16> to vector<8x8xf32>
    %cst_50 = arith.constant 0.353553385 : f32
    %89 = vector.broadcast %cst_50 : f32 to vector<8x8xf32>
    %90 = arith.mulf %88, %89 : vector<8x8xf32>
    %91 = arith.truncf %90 : vector<8x8xf32> to vector<8x8xbf16>
    %92 = vector.extract_strided_slice %6 {offsets = [0, 16], sizes = [8, 8], strides = [1, 1]} : vector<8x64xbf16> to vector<8x8xbf16>
    %93 = vector.extract_strided_slice %6 {offsets = [0, 48], sizes = [8, 8], strides = [1, 1]} : vector<8x64xbf16> to vector<8x8xbf16>
    %cst_51 = arith.constant dense<0.000000e+00> : vector<8x8xf32>
    %94 = tpu.matmul %91, %92, %cst_51 {dimension_numbers = #tpu.dot_dimension_numbers<[1], [1], [0], [0], [0, 0, 1, 0], [], []>} : vector<8x8xbf16>, vector<8x8xbf16>, vector<8x8xf32> -> vector<8x8xf32>
    %c2 = arith.constant 2 : index
    %c0_52 = arith.constant 0 : index
    %c0_53 = arith.constant 0 : index
    %95 = vector.load %arg6[%c2, %c0_52, %c0_53] : memref<4x8x1xf32, #tpu.memory_space<vmem>>, vector<1x8x1xf32>
    %96 = vector.shape_cast %95 : vector<1x8x1xf32> to vector<8x1xf32>
    %cst_54 = arith.constant dense<0xFF800000> : vector<8xf32>
    %97 = vector.multi_reduction <maximumf>, %94, %cst_54 [1] : vector<8x8xf32> to vector<8xf32>
    %98 = vector.shape_cast %97 : vector<8xf32> to vector<8x1xf32>
    %99 = arith.maximumf %96, %98 : vector<8x1xf32>
    %100 = arith.subf %96, %99 : vector<8x1xf32>
    %101 = math.exp %100 : vector<8x1xf32>
    %102 = vector.broadcast %99 : vector<8x1xf32> to vector<8x8xf32>
    %103 = arith.subf %94, %102 : vector<8x8xf32>
    %104 = math.exp %103 : vector<8x8xf32>
    %c2_55 = arith.constant 2 : index
    %c0_56 = arith.constant 0 : index
    %c0_57 = arith.constant 0 : index
    %105 = vector.load %arg7[%c2_55, %c0_56, %c0_57] : memref<4x8x1xf32, #tpu.memory_space<vmem>>, vector<1x8x1xf32>
    %106 = vector.shape_cast %105 : vector<1x8x1xf32> to vector<8x1xf32>
    %107 = arith.mulf %101, %106 : vector<8x1xf32>
    %cst_58 = arith.constant dense<0.000000e+00> : vector<8xf32>
    %108 = vector.multi_reduction <add>, %104, %cst_58 [1] : vector<8x8xf32> to vector<8xf32>
    %109 = vector.shape_cast %108 : vector<8xf32> to vector<8x1xf32>
    %110 = arith.addf %107, %109 : vector<8x1xf32>
    %c2_59 = arith.constant 2 : index
    %c0_60 = arith.constant 0 : index
    %c0_61 = arith.constant 0 : index
    %111 = vector.load %arg7[%c2_59, %c0_60, %c0_61] : memref<4x8x1xf32, #tpu.memory_space<vmem>>, vector<1x8x1xf32>
    %112 = vector.shape_cast %111 : vector<1x8x1xf32> to vector<8x1xf32>
    %113 = vector.shape_cast %110 : vector<8x1xf32> to vector<1x8x1xf32>
    tpu.vector_store %arg7[%c2_59, %c0_60, %c0_61], %113 {strides = array<i32>} : memref<4x8x1xf32, #tpu.memory_space<vmem>>, vector<1x8x1xf32>,
    %c2_62 = arith.constant 2 : index
    %c0_63 = arith.constant 0 : index
    %c0_64 = arith.constant 0 : index
    %114 = vector.load %arg8[%c2_62, %c0_63, %c0_64] : memref<4x8x8xf32, #tpu.memory_space<vmem>>, vector<1x8x8xf32>
    %115 = vector.shape_cast %114 : vector<1x8x8xf32> to vector<8x8xf32>
    %116 = vector.broadcast %101 : vector<8x1xf32> to vector<8x8xf32>
    %117 = arith.mulf %116, %115 : vector<8x8xf32>
    %118 = arith.truncf %104 : vector<8x8xf32> to vector<8x8xbf16>
    %cst_65 = arith.constant dense<0.000000e+00> : vector<8x8xf32>
    %119 = tpu.matmul %118, %93, %cst_65 {dimension_numbers = #tpu.dot_dimension_numbers<[1], [0], [0], [1], [0, 0, 1, 1], [], []>} : vector<8x8xbf16>, vector<8x8xbf16>, vector<8x8xf32> -> vector<8x8xf32>
    %120 = arith.addf %117, %119 : vector<8x8xf32>
    %c2_66 = arith.constant 2 : index
    %c0_67 = arith.constant 0 : index
    %c0_68 = arith.constant 0 : index
    %121 = vector.load %arg8[%c2_66, %c0_67, %c0_68] : memref<4x8x8xf32, #tpu.memory_space<vmem>>, vector<1x8x8xf32>
    %122 = vector.shape_cast %121 : vector<1x8x8xf32> to vector<8x8xf32>
    %123 = vector.shape_cast %120 : vector<8x8xf32> to vector<1x8x8xf32>
    tpu.vector_store %arg8[%c2_66, %c0_67, %c0_68], %123 {strides = array<i32>} : memref<4x8x8xf32, #tpu.memory_space<vmem>>, vector<1x8x8xf32>,
    %c2_69 = arith.constant 2 : index
    %c0_70 = arith.constant 0 : index
    %c0_71 = arith.constant 0 : index
    %124 = vector.load %arg6[%c2_69, %c0_70, %c0_71] : memref<4x8x1xf32, #tpu.memory_space<vmem>>, vector<1x8x1xf32>
    %125 = vector.shape_cast %124 : vector<1x8x1xf32> to vector<8x1xf32>
    %126 = vector.shape_cast %99 : vector<8x1xf32> to vector<1x8x1xf32>
    tpu.vector_store %arg6[%c2_69, %c0_70, %c0_71], %126 {strides = array<i32>} : memref<4x8x1xf32, #tpu.memory_space<vmem>>, vector<1x8x1xf32>,
    %127 = vector.extract_strided_slice %4 {offsets = [0, 24], sizes = [8, 8], strides = [1, 1]} : vector<8x32xbf16> to vector<8x8xbf16>
    %128 = arith.extf %127 : vector<8x8xbf16> to vector<8x8xf32>
    %cst_72 = arith.constant 0.353553385 : f32
    %129 = vector.broadcast %cst_72 : f32 to vector<8x8xf32>
    %130 = arith.mulf %128, %129 : vector<8x8xf32>
    %131 = arith.truncf %130 : vector<8x8xf32> to vector<8x8xbf16>
    %132 = vector.extract_strided_slice %6 {offsets = [0, 24], sizes = [8, 8], strides = [1, 1]} : vector<8x64xbf16> to vector<8x8xbf16>
    %133 = vector.extract_strided_slice %6 {offsets = [0, 56], sizes = [8, 8], strides = [1, 1]} : vector<8x64xbf16> to vector<8x8xbf16>
    %cst_73 = arith.constant dense<0.000000e+00> : vector<8x8xf32>
    %134 = tpu.matmul %131, %132, %cst_73 {dimension_numbers = #tpu.dot_dimension_numbers<[1], [1], [0], [0], [0, 0, 1, 0], [], []>} : vector<8x8xbf16>, vector<8x8xbf16>, vector<8x8xf32> -> vector<8x8xf32>
    %c3 = arith.constant 3 : index
    %c0_74 = arith.constant 0 : index
    %c0_75 = arith.constant 0 : index
    %135 = vector.load %arg6[%c3, %c0_74, %c0_75] : memref<4x8x1xf32, #tpu.memory_space<vmem>>, vector<1x8x1xf32>
    %136 = vector.shape_cast %135 : vector<1x8x1xf32> to vector<8x1xf32>
    %cst_76 = arith.constant dense<0xFF800000> : vector<8xf32>
    %137 = vector.multi_reduction <maximumf>, %134, %cst_76 [1] : vector<8x8xf32> to vector<8xf32>
    %138 = vector.shape_cast %137 : vector<8xf32> to vector<8x1xf32>
    %139 = arith.maximumf %136, %138 : vector<8x1xf32>
    %140 = arith.subf %136, %139 : vector<8x1xf32>
    %141 = math.exp %140 : vector<8x1xf32>
    %142 = vector.broadcast %139 : vector<8x1xf32> to vector<8x8xf32>
    %143 = arith.subf %134, %142 : vector<8x8xf32>
    %144 = math.exp %143 : vector<8x8xf32>
    %c3_77 = arith.constant 3 : index
    %c0_78 = arith.constant 0 : index
    %c0_79 = arith.constant 0 : index
    %145 = vector.load %arg7[%c3_77, %c0_78, %c0_79] : memref<4x8x1xf32, #tpu.memory_space<vmem>>, vector<1x8x1xf32>
    %146 = vector.shape_cast %145 : vector<1x8x1xf32> to vector<8x1xf32>
    %147 = arith.mulf %141, %146 : vector<8x1xf32>
    %cst_80 = arith.constant dense<0.000000e+00> : vector<8xf32>
    %148 = vector.multi_reduction <add>, %144, %cst_80 [1] : vector<8x8xf32> to vector<8xf32>
    %149 = vector.shape_cast %148 : vector<8xf32> to vector<8x1xf32>
    %150 = arith.addf %147, %149 : vector<8x1xf32>
    %c3_81 = arith.constant 3 : index
    %c0_82 = arith.constant 0 : index
    %c0_83 = arith.constant 0 : index
    %151 = vector.load %arg7[%c3_81, %c0_82, %c0_83] : memref<4x8x1xf32, #tpu.memory_space<vmem>>, vector<1x8x1xf32>
    %152 = vector.shape_cast %151 : vector<1x8x1xf32> to vector<8x1xf32>
    %153 = vector.shape_cast %150 : vector<8x1xf32> to vector<1x8x1xf32>
    tpu.vector_store %arg7[%c3_81, %c0_82, %c0_83], %153 {strides = array<i32>} : memref<4x8x1xf32, #tpu.memory_space<vmem>>, vector<1x8x1xf32>,
    %c3_84 = arith.constant 3 : index
    %c0_85 = arith.constant 0 : index
    %c0_86 = arith.constant 0 : index
    %154 = vector.load %arg8[%c3_84, %c0_85, %c0_86] : memref<4x8x8xf32, #tpu.memory_space<vmem>>, vector<1x8x8xf32>
    %155 = vector.shape_cast %154 : vector<1x8x8xf32> to vector<8x8xf32>
    %156 = vector.broadcast %141 : vector<8x1xf32> to vector<8x8xf32>
    %157 = arith.mulf %156, %155 : vector<8x8xf32>
    %158 = arith.truncf %144 : vector<8x8xf32> to vector<8x8xbf16>
    %cst_87 = arith.constant dense<0.000000e+00> : vector<8x8xf32>
    %159 = tpu.matmul %158, %133, %cst_87 {dimension_numbers = #tpu.dot_dimension_numbers<[1], [0], [0], [1], [0, 0, 1, 1], [], []>} : vector<8x8xbf16>, vector<8x8xbf16>, vector<8x8xf32> -> vector<8x8xf32>
    %160 = arith.addf %157, %159 : vector<8x8xf32>
    %c3_88 = arith.constant 3 : index
    %c0_89 = arith.constant 0 : index
    %c0_90 = arith.constant 0 : index
    %161 = vector.load %arg8[%c3_88, %c0_89, %c0_90] : memref<4x8x8xf32, #tpu.memory_space<vmem>>, vector<1x8x8xf32>
    %162 = vector.shape_cast %161 : vector<1x8x8xf32> to vector<8x8xf32>
    %163 = vector.shape_cast %160 : vector<8x8xf32> to vector<1x8x8xf32>
    tpu.vector_store %arg8[%c3_88, %c0_89, %c0_90], %163 {strides = array<i32>} : memref<4x8x8xf32, #tpu.memory_space<vmem>>, vector<1x8x8xf32>,
    %c3_91 = arith.constant 3 : index
    %c0_92 = arith.constant 0 : index
    %c0_93 = arith.constant 0 : index
    %164 = vector.load %arg6[%c3_91, %c0_92, %c0_93] : memref<4x8x1xf32, #tpu.memory_space<vmem>>, vector<1x8x1xf32>
    %165 = vector.shape_cast %164 : vector<1x8x1xf32> to vector<8x1xf32>
    %166 = vector.shape_cast %139 : vector<8x1xf32> to vector<1x8x1xf32>
    tpu.vector_store %arg6[%c3_91, %c0_92, %c0_93], %166 {strides = array<i32>} : memref<4x8x1xf32, #tpu.memory_space<vmem>>, vector<1x8x1xf32>,
    %c0_i32_94 = arith.constant 0 : i32
    %167 = arith.cmpi eq, %arg2, %c0_i32_94 : i32
    %168 = arith.extui %167 : i1 to i32
    %c0_i32_95 = arith.constant 0 : i32
    %169 = arith.cmpi ne, %168, %c0_i32_95 : i32
    scf.if %169 {
      %c0_96 = arith.constant 0 : index
      %c0_97 = arith.constant 0 : index
      %c0_98 = arith.constant 0 : index
      %170 = vector.load %arg7[%c0_96, %c0_97, %c0_98] : memref<4x8x1xf32, #tpu.memory_space<vmem>>, vector<1x8x1xf32>
      %171 = vector.shape_cast %170 : vector<1x8x1xf32> to vector<8x1xf32>
      %172 = tpu.reciprocal %171 {approx = true} : vector<8x1xf32> -> vector<8x1xf32>
      %c0_99 = arith.constant 0 : index
      %c0_100 = arith.constant 0 : index
      %c0_101 = arith.constant 0 : index
      %173 = vector.load %arg8[%c0_99, %c0_100, %c0_101] : memref<4x8x8xf32, #tpu.memory_space<vmem>>, vector<1x8x8xf32>
      %174 = vector.shape_cast %173 : vector<1x8x8xf32> to vector<8x8xf32>
      %175 = vector.broadcast %172 : vector<8x1xf32> to vector<8x8xf32>
      %176 = arith.mulf %174, %175 : vector<8x8xf32>
      %177 = arith.truncf %176 : vector<8x8xf32> to vector<8x8xbf16>
      %c0_102 = arith.constant 0 : index
      %c0_103 = arith.constant 0 : index
      %c0_104 = arith.constant 0 : index
      %178 = vector.load %arg5[%c0_102, %c0_103, %c0_104] : memref<1x8x32xbf16, #tpu.memory_space<vmem>>, vector<1x8x8xbf16>
      %179 = vector.shape_cast %178 : vector<1x8x8xbf16> to vector<8x8xbf16>
      %180 = vector.shape_cast %177 : vector<8x8xbf16> to vector<1x8x8xbf16>
      tpu.vector_store %arg5[%c0_102, %c0_103, %c0_104], %180 {strides = array<i32>} : memref<1x8x32xbf16, #tpu.memory_space<vmem>>, vector<1x8x8xbf16>,
      %c1_105 = arith.constant 1 : index
      %c0_106 = arith.constant 0 : index
      %c0_107 = arith.constant 0 : index
      %181 = vector.load %arg7[%c1_105, %c0_106, %c0_107] : memref<4x8x1xf32, #tpu.memory_space<vmem>>, vector<1x8x1xf32>
      %182 = vector.shape_cast %181 : vector<1x8x1xf32> to vector<8x1xf32>
      %183 = tpu.reciprocal %182 {approx = true} : vector<8x1xf32> -> vector<8x1xf32>
      %c1_108 = arith.constant 1 : index
      %c0_109 = arith.constant 0 : index
      %c0_110 = arith.constant 0 : index
      %184 = vector.load %arg8[%c1_108, %c0_109, %c0_110] : memref<4x8x8xf32, #tpu.memory_space<vmem>>, vector<1x8x8xf32>
      %185 = vector.shape_cast %184 : vector<1x8x8xf32> to vector<8x8xf32>
      %186 = vector.broadcast %183 : vector<8x1xf32> to vector<8x8xf32>
      %187 = arith.mulf %185, %186 : vector<8x8xf32>
      %188 = arith.truncf %187 : vector<8x8xf32> to vector<8x8xbf16>
      %c0_111 = arith.constant 0 : index
      %c0_112 = arith.constant 0 : index
      %c8 = arith.constant 8 : index
      %189 = vector.load %arg5[%c0_111, %c0_112, %c8] : memref<1x8x32xbf16, #tpu.memory_space<vmem>>, vector<1x8x8xbf16>
      %190 = vector.shape_cast %189 : vector<1x8x8xbf16> to vector<8x8xbf16>
      %191 = vector.shape_cast %188 : vector<8x8xbf16> to vector<1x8x8xbf16>
      tpu.vector_store %arg5[%c0_111, %c0_112, %c8], %191 {strides = array<i32>} : memref<1x8x32xbf16, #tpu.memory_space<vmem>>, vector<1x8x8xbf16>,
      %c2_113 = arith.constant 2 : index
      %c0_114 = arith.constant 0 : index
      %c0_115 = arith.constant 0 : index
      %192 = vector.load %arg7[%c2_113, %c0_114, %c0_115] : memref<4x8x1xf32, #tpu.memory_space<vmem>>, vector<1x8x1xf32>
      %193 = vector.shape_cast %192 : vector<1x8x1xf32> to vector<8x1xf32>
      %194 = tpu.reciprocal %193 {approx = true} : vector<8x1xf32> -> vector<8x1xf32>
      %c2_116 = arith.constant 2 : index
      %c0_117 = arith.constant 0 : index
      %c0_118 = arith.constant 0 : index
      %195 = vector.load %arg8[%c2_116, %c0_117, %c0_118] : memref<4x8x8xf32, #tpu.memory_space<vmem>>, vector<1x8x8xf32>
      %196 = vector.shape_cast %195 : vector<1x8x8xf32> to vector<8x8xf32>
      %197 = vector.broadcast %194 : vector<8x1xf32> to vector<8x8xf32>
      %198 = arith.mulf %196, %197 : vector<8x8xf32>
      %199 = arith.truncf %198 : vector<8x8xf32> to vector<8x8xbf16>
      %c0_119 = arith.constant 0 : index
      %c0_120 = arith.constant 0 : index
      %c16 = arith.constant 16 : index
      %200 = vector.load %arg5[%c0_119, %c0_120, %c16] : memref<1x8x32xbf16, #tpu.memory_space<vmem>>, vector<1x8x8xbf16>
      %201 = vector.shape_cast %200 : vector<1x8x8xbf16> to vector<8x8xbf16>
      %202 = vector.shape_cast %199 : vector<8x8xbf16> to vector<1x8x8xbf16>
      tpu.vector_store %arg5[%c0_119, %c0_120, %c16], %202 {strides = array<i32>} : memref<1x8x32xbf16, #tpu.memory_space<vmem>>, vector<1x8x8xbf16>,
      %c3_121 = arith.constant 3 : index
      %c0_122 = arith.constant 0 : index
      %c0_123 = arith.constant 0 : index
      %203 = vector.load %arg7[%c3_121, %c0_122, %c0_123] : memref<4x8x1xf32, #tpu.memory_space<vmem>>, vector<1x8x1xf32>
      %204 = vector.shape_cast %203 : vector<1x8x1xf32> to vector<8x1xf32>
      %205 = tpu.reciprocal %204 {approx = true} : vector<8x1xf32> -> vector<8x1xf32>
      %c3_124 = arith.constant 3 : index
      %c0_125 = arith.constant 0 : index
      %c0_126 = arith.constant 0 : index
      %206 = vector.load %arg8[%c3_124, %c0_125, %c0_126] : memref<4x8x8xf32, #tpu.memory_space<vmem>>, vector<1x8x8xf32>
      %207 = vector.shape_cast %206 : vector<1x8x8xf32> to vector<8x8xf32>
      %208 = vector.broadcast %205 : vector<8x1xf32> to vector<8x8xf32>
      %209 = arith.mulf %207, %208 : vector<8x8xf32>
      %210 = arith.truncf %209 : vector<8x8xf32> to vector<8x8xbf16>
      %c0_127 = arith.constant 0 : index
      %c0_128 = arith.constant 0 : index
      %c24 = arith.constant 24 : index
      %211 = vector.load %arg5[%c0_127, %c0_128, %c24] : memref<1x8x32xbf16, #tpu.memory_space<vmem>>, vector<1x8x8xbf16>
      %212 = vector.shape_cast %211 : vector<1x8x8xbf16> to vector<8x8xbf16>
      %213 = vector.shape_cast %210 : vector<8x8xbf16> to vector<1x8x8xbf16>
      tpu.vector_store %arg5[%c0_127, %c0_128, %c24], %213 {strides = array<i32>} : memref<1x8x32xbf16, #tpu.memory_space<vmem>>, vector<1x8x8xbf16>,
    } else {
    }
    return
  }
  func.func @transform_0(%arg0: i32, %arg1: i32, %arg2: i32) -> (i32, i32, i32) {
    %c0_i32 = arith.constant 0 : i32
    %c0_i32_0 = arith.constant 0 : i32
    return %arg0, %arg1, %c0_i32 : i32, i32, i32
  }
  func.func @transform_1(%arg0: i32, %arg1: i32, %arg2: i32) -> (i32, i32, i32) {
    %c0_i32 = arith.constant 0 : i32
    %c0_i32_0 = arith.constant 0 : i32
    return %arg0, %arg2, %c0_i32 : i32, i32, i32
  }
  func.func @transform_2(%arg0: i32, %arg1: i32, %arg2: i32) -> (i32, i32, i32) {
    %c0_i32 = arith.constant 0 : i32
    %c0_i32_0 = arith.constant 0 : i32
    return %arg0, %arg1, %c0_i32 : i32, i32, i32
  }
}

module attributes {stable_mosaic.version = 11 : i64} {
  func.func @_matmul_bias_kernel(%arg0: i32, %arg1: i32, %arg2: i32, %arg3: memref<16x32xbf16, #tpu.memory_space<vmem>>, %arg4: memref<32x64xbf16, #tpu.memory_space<vmem>>, %arg5: memref<1x64xf32, #tpu.memory_space<vmem>>, %arg6: memref<16x64xbf16, #tpu.memory_space<vmem>>, %arg7: memref<16x64xf32, #tpu.memory_space<vmem>>) attributes {dimension_semantics = [#tpu.dimension_semantics<parallel>, #tpu.dimension_semantics<parallel>, #tpu.dimension_semantics<arbitrary>], iteration_bounds = array<i64: 1, 1, 1>, scalar_prefetch = 0 : i64, scratch_operands = 1 : i64, tpu.core_type = #tpu.core_type<tc>, window_params = [{transform_indices = @transform_0, window_bounds = array<i64: 16, 32>}, {transform_indices = @transform_1, window_bounds = array<i64: 32, 64>}, {transform_indices = @transform_2, window_bounds = array<i64: 1, 64>}, {transform_indices = @transform_3, window_bounds = array<i64: 16, 64>}]} {
    %c0_i32 = arith.constant 0 : i32
    %0 = arith.cmpi eq, %arg2, %c0_i32 : i32
    %1 = arith.extui %0 : i1 to i32
    %c0_i32_0 = arith.constant 0 : i32
    %2 = arith.cmpi ne, %1, %c0_i32_0 : i32
    scf.if %2 {
      %cst_10 = arith.constant 0.000000e+00 : f32
      %12 = vector.broadcast %cst_10 : f32 to vector<16x64xf32>
      %c0_11 = arith.constant 0 : index
      %c0_12 = arith.constant 0 : index
      %13 = vector.load %arg7[%c0_11, %c0_12] : memref<16x64xf32, #tpu.memory_space<vmem>>, vector<16x64xf32>
      tpu.vector_store %arg7[%c0_11, %c0_12], %12 {strides = array<i32>} : memref<16x64xf32, #tpu.memory_space<vmem>>, vector<16x64xf32>,
    } else {
    }
    %c0 = arith.constant 0 : index
    %c0_1 = arith.constant 0 : index
    %3 = vector.load %arg7[%c0, %c0_1] : memref<16x64xf32, #tpu.memory_space<vmem>>, vector<16x64xf32>
    %c0_2 = arith.constant 0 : index
    %c0_3 = arith.constant 0 : index
    %4 = vector.load %arg3[%c0_2, %c0_3] : memref<16x32xbf16, #tpu.memory_space<vmem>>, vector<16x32xbf16>
    %c0_4 = arith.constant 0 : index
    %c0_5 = arith.constant 0 : index
    %5 = vector.load %arg4[%c0_4, %c0_5] : memref<32x64xbf16, #tpu.memory_space<vmem>>, vector<32x64xbf16>
    %cst = arith.constant dense<0.000000e+00> : vector<16x64xf32>
    %6 = tpu.matmul %4, %5, %cst {dimension_numbers = #tpu.dot_dimension_numbers<[1], [0], [0], [1], [0, 0, 1, 1], [], []>} : vector<16x32xbf16>, vector<32x64xbf16>, vector<16x64xf32> -> vector<16x64xf32>
    %7 = arith.addf %3, %6 : vector<16x64xf32>
    %c0_6 = arith.constant 0 : index
    %c0_7 = arith.constant 0 : index
    %8 = vector.load %arg7[%c0_6, %c0_7] : memref<16x64xf32, #tpu.memory_space<vmem>>, vector<16x64xf32>
    tpu.vector_store %arg7[%c0_6, %c0_7], %7 {strides = array<i32>} : memref<16x64xf32, #tpu.memory_space<vmem>>, vector<16x64xf32>,
    %c0_i32_8 = arith.constant 0 : i32
    %9 = arith.cmpi eq, %arg2, %c0_i32_8 : i32
    %10 = arith.extui %9 : i1 to i32
    %c0_i32_9 = arith.constant 0 : i32
    %11 = arith.cmpi ne, %10, %c0_i32_9 : i32
    scf.if %11 {
      %c0_10 = arith.constant 0 : index
      %c0_11 = arith.constant 0 : index
      %12 = vector.load %arg7[%c0_10, %c0_11] : memref<16x64xf32, #tpu.memory_space<vmem>>, vector<16x64xf32>
      %c0_12 = arith.constant 0 : index
      %c0_13 = arith.constant 0 : index
      %13 = vector.load %arg5[%c0_12, %c0_13] : memref<1x64xf32, #tpu.memory_space<vmem>>, vector<1x64xf32>
      %14 = vector.broadcast %13 : vector<1x64xf32> to vector<16x64xf32>
      %15 = arith.addf %12, %14 : vector<16x64xf32>
      %cst_14 = arith.constant 0.000000e+00 : f32
      %16 = vector.broadcast %cst_14 : f32 to vector<16x64xf32>
      %17 = arith.maximumf %15, %16 : vector<16x64xf32>
      %18 = arith.truncf %17 : vector<16x64xf32> to vector<16x64xbf16>
      %c0_15 = arith.constant 0 : index
      %c0_16 = arith.constant 0 : index
      %19 = vector.load %arg6[%c0_15, %c0_16] : memref<16x64xbf16, #tpu.memory_space<vmem>>, vector<16x64xbf16>
      tpu.vector_store %arg6[%c0_15, %c0_16], %18 {strides = array<i32>} : memref<16x64xbf16, #tpu.memory_space<vmem>>, vector<16x64xbf16>,
    } else {
    }
    return
  }
  func.func @transform_0(%arg0: i32, %arg1: i32, %arg2: i32) -> (i32, i32) {
    %c0_i32 = arith.constant 0 : i32
    return %arg0, %arg2 : i32, i32
  }
  func.func @transform_1(%arg0: i32, %arg1: i32, %arg2: i32) -> (i32, i32) {
    %c0_i32 = arith.constant 0 : i32
    return %arg2, %arg1 : i32, i32
  }
  func.func @transform_2(%arg0: i32, %arg1: i32, %arg2: i32) -> (i32, i32) {
    %c0_i32 = arith.constant 0 : i32
    %c0_i32_0 = arith.constant 0 : i32
    return %c0_i32, %arg1 : i32, i32
  }
  func.func @transform_3(%arg0: i32, %arg1: i32, %arg2: i32) -> (i32, i32) {
    %c0_i32 = arith.constant 0 : i32
    return %arg0, %arg1 : i32, i32
  }
}

module attributes {stable_mosaic.version = 11 : i64} {
  func.func @_matmul_bias_add_ln_kernel(%arg0: i32, %arg1: i32, %arg2: memref<16x64xbf16, #tpu.memory_space<vmem>>, %arg3: memref<64x32xbf16, #tpu.memory_space<vmem>>, %arg4: memref<1x32xf32, #tpu.memory_space<vmem>>, %arg5: memref<16x32xbf16, #tpu.memory_space<vmem>>, %arg6: memref<1x32xf32, #tpu.memory_space<vmem>>, %arg7: memref<1x32xf32, #tpu.memory_space<vmem>>, %arg8: memref<16x32xbf16, #tpu.memory_space<vmem>>, %arg9: memref<16x32xf32, #tpu.memory_space<vmem>>) attributes {dimension_semantics = [#tpu.dimension_semantics<parallel>, #tpu.dimension_semantics<arbitrary>], iteration_bounds = array<i64: 1, 1>, scalar_prefetch = 0 : i64, scratch_operands = 1 : i64, tpu.core_type = #tpu.core_type<tc>, window_params = [{transform_indices = @transform_0, window_bounds = array<i64: 16, 64>}, {transform_indices = @transform_1, window_bounds = array<i64: 64, 32>}, {pipeline_mode = #tpu.pipeline_mode<synchronous>, transform_indices = @transform_2, window_bounds = array<i64: 1, 32>}, {transform_indices = @transform_3, window_bounds = array<i64: 16, 32>}, {pipeline_mode = #tpu.pipeline_mode<synchronous>, transform_indices = @transform_4, window_bounds = array<i64: 1, 32>}, {pipeline_mode = #tpu.pipeline_mode<synchronous>, transform_indices = @transform_5, window_bounds = array<i64: 1, 32>}, {transform_indices = @transform_6, window_bounds = array<i64: 16, 32>}]} {
    %c0_i32 = arith.constant 0 : i32
    %0 = arith.cmpi eq, %arg1, %c0_i32 : i32
    %1 = arith.extui %0 : i1 to i32
    %c0_i32_0 = arith.constant 0 : i32
    %2 = arith.cmpi ne, %1, %c0_i32_0 : i32
    scf.if %2 {
      %cst_10 = arith.constant 0.000000e+00 : f32
      %12 = vector.broadcast %cst_10 : f32 to vector<16x32xf32>
      %c0_11 = arith.constant 0 : index
      %c0_12 = arith.constant 0 : index
      %13 = vector.load %arg9[%c0_11, %c0_12] : memref<16x32xf32, #tpu.memory_space<vmem>>, vector<16x32xf32>
      tpu.vector_store %arg9[%c0_11, %c0_12], %12 {strides = array<i32>} : memref<16x32xf32, #tpu.memory_space<vmem>>, vector<16x32xf32>,
    } else {
    }
    %c0 = arith.constant 0 : index
    %c0_1 = arith.constant 0 : index
    %3 = vector.load %arg9[%c0, %c0_1] : memref<16x32xf32, #tpu.memory_space<vmem>>, vector<16x32xf32>
    %c0_2 = arith.constant 0 : index
    %c0_3 = arith.constant 0 : index
    %4 = vector.load %arg2[%c0_2, %c0_3] : memref<16x64xbf16, #tpu.memory_space<vmem>>, vector<16x64xbf16>
    %c0_4 = arith.constant 0 : index
    %c0_5 = arith.constant 0 : index
    %5 = vector.load %arg3[%c0_4, %c0_5] : memref<64x32xbf16, #tpu.memory_space<vmem>>, vector<64x32xbf16>
    %cst = arith.constant dense<0.000000e+00> : vector<16x32xf32>
    %6 = tpu.matmul %4, %5, %cst {dimension_numbers = #tpu.dot_dimension_numbers<[1], [0], [0], [1], [0, 0, 1, 1], [], []>} : vector<16x64xbf16>, vector<64x32xbf16>, vector<16x32xf32> -> vector<16x32xf32>
    %7 = arith.addf %3, %6 : vector<16x32xf32>
    %c0_6 = arith.constant 0 : index
    %c0_7 = arith.constant 0 : index
    %8 = vector.load %arg9[%c0_6, %c0_7] : memref<16x32xf32, #tpu.memory_space<vmem>>, vector<16x32xf32>
    tpu.vector_store %arg9[%c0_6, %c0_7], %7 {strides = array<i32>} : memref<16x32xf32, #tpu.memory_space<vmem>>, vector<16x32xf32>,
    %c0_i32_8 = arith.constant 0 : i32
    %9 = arith.cmpi eq, %arg1, %c0_i32_8 : i32
    %10 = arith.extui %9 : i1 to i32
    %c0_i32_9 = arith.constant 0 : i32
    %11 = arith.cmpi ne, %10, %c0_i32_9 : i32
    scf.if %11 {
      %c0_10 = arith.constant 0 : index
      %c0_11 = arith.constant 0 : index
      %12 = vector.load %arg9[%c0_10, %c0_11] : memref<16x32xf32, #tpu.memory_space<vmem>>, vector<16x32xf32>
      %c0_12 = arith.constant 0 : index
      %c0_13 = arith.constant 0 : index
      %13 = vector.load %arg4[%c0_12, %c0_13] : memref<1x32xf32, #tpu.memory_space<vmem>>, vector<1x32xf32>
      %14 = vector.broadcast %13 : vector<1x32xf32> to vector<16x32xf32>
      %15 = arith.addf %12, %14 : vector<16x32xf32>
      %c0_14 = arith.constant 0 : index
      %c0_15 = arith.constant 0 : index
      %16 = vector.load %arg5[%c0_14, %c0_15] : memref<16x32xbf16, #tpu.memory_space<vmem>>, vector<16x32xbf16>
      %17 = arith.extf %16 : vector<16x32xbf16> to vector<16x32xf32>
      %18 = arith.addf %15, %17 : vector<16x32xf32>
      %cst_16 = arith.constant dense<0.000000e+00> : vector<16xf32>
      %19 = vector.multi_reduction <add>, %18, %cst_16 [1] : vector<16x32xf32> to vector<16xf32>
      %20 = vector.shape_cast %19 : vector<16xf32> to vector<16x1xf32>
      %cst_17 = arith.constant 3.200000e+01 : f32
      %21 = vector.broadcast %cst_17 : f32 to vector<16x1xf32>
      %22 = arith.divf %20, %21 : vector<16x1xf32>
      %23 = arith.mulf %18, %18 : vector<16x32xf32>
      %cst_18 = arith.constant dense<0.000000e+00> : vector<16xf32>
      %24 = vector.multi_reduction <add>, %23, %cst_18 [1] : vector<16x32xf32> to vector<16xf32>
      %25 = vector.shape_cast %24 : vector<16xf32> to vector<16x1xf32>
      %cst_19 = arith.constant 3.200000e+01 : f32
      %26 = vector.broadcast %cst_19 : f32 to vector<16x1xf32>
      %27 = arith.divf %25, %26 : vector<16x1xf32>
      %28 = arith.mulf %22, %22 : vector<16x1xf32>
      %29 = arith.subf %27, %28 : vector<16x1xf32>
      %cst_20 = arith.constant 0.000000e+00 : f32
      %30 = vector.broadcast %cst_20 : f32 to vector<16x1xf32>
      %31 = arith.maximumf %29, %30 : vector<16x1xf32>
      %32 = vector.broadcast %22 : vector<16x1xf32> to vector<16x32xf32>
      %33 = arith.subf %18, %32 : vector<16x32xf32>
      %cst_21 = arith.constant 9.99999974E-6 : f32
      %34 = vector.broadcast %cst_21 : f32 to vector<16x1xf32>
      %35 = arith.addf %31, %34 : vector<16x1xf32>
      %36 = math.rsqrt %35 : vector<16x1xf32>
      %37 = vector.broadcast %36 : vector<16x1xf32> to vector<16x32xf32>
      %38 = arith.mulf %33, %37 : vector<16x32xf32>
      %c0_22 = arith.constant 0 : index
      %c0_23 = arith.constant 0 : index
      %39 = vector.load %arg6[%c0_22, %c0_23] : memref<1x32xf32, #tpu.memory_space<vmem>>, vector<1x32xf32>
      %40 = vector.broadcast %39 : vector<1x32xf32> to vector<16x32xf32>
      %41 = arith.mulf %38, %40 : vector<16x32xf32>
      %c0_24 = arith.constant 0 : index
      %c0_25 = arith.constant 0 : index
      %42 = vector.load %arg7[%c0_24, %c0_25] : memref<1x32xf32, #tpu.memory_space<vmem>>, vector<1x32xf32>
      %43 = vector.broadcast %42 : vector<1x32xf32> to vector<16x32xf32>
      %44 = arith.addf %41, %43 : vector<16x32xf32>
      %45 = arith.truncf %44 : vector<16x32xf32> to vector<16x32xbf16>
      %c0_26 = arith.constant 0 : index
      %c0_27 = arith.constant 0 : index
      %46 = vector.load %arg8[%c0_26, %c0_27] : memref<16x32xbf16, #tpu.memory_space<vmem>>, vector<16x32xbf16>
      tpu.vector_store %arg8[%c0_26, %c0_27], %45 {strides = array<i32>} : memref<16x32xbf16, #tpu.memory_space<vmem>>, vector<16x32xbf16>,
    } else {
    }
    return
  }
  func.func @transform_0(%arg0: i32, %arg1: i32) -> (i32, i32) {
    %c0_i32 = arith.constant 0 : i32
    return %arg0, %arg1 : i32, i32
  }
  func.func @transform_1(%arg0: i32, %arg1: i32) -> (i32, i32) {
    %c0_i32 = arith.constant 0 : i32
    %c0_i32_0 = arith.constant 0 : i32
    return %arg1, %c0_i32 : i32, i32
  }
  func.func @transform_2(%arg0: i32, %arg1: i32) -> (i32, i32) {
    %c0_i32 = arith.constant 0 : i32
    %c0_i32_0 = arith.constant 0 : i32
    %c0_i32_1 = arith.constant 0 : i32
    return %c0_i32, %c0_i32_0 : i32, i32
  }
  func.func @transform_3(%arg0: i32, %arg1: i32) -> (i32, i32) {
    %c0_i32 = arith.constant 0 : i32
    %c0_i32_0 = arith.constant 0 : i32
    return %arg0, %c0_i32 : i32, i32
  }
  func.func @transform_4(%arg0: i32, %arg1: i32) -> (i32, i32) {
    %c0_i32 = arith.constant 0 : i32
    %c0_i32_0 = arith.constant 0 : i32
    %c0_i32_1 = arith.constant 0 : i32
    return %c0_i32, %c0_i32_0 : i32, i32
  }
  func.func @transform_5(%arg0: i32, %arg1: i32) -> (i32, i32) {
    %c0_i32 = arith.constant 0 : i32
    %c0_i32_0 = arith.constant 0 : i32
    %c0_i32_1 = arith.constant 0 : i32
    return %c0_i32, %c0_i32_0 : i32, i32
  }
  func.func @transform_6(%arg0: i32, %arg1: i32) -> (i32, i32) {
    %c0_i32 = arith.constant 0 : i32
    %c0_i32_0 = arith.constant 0 : i32
    return %arg0, %c0_i32 : i32, i32
  }
}

module attributes {stable_mosaic.version = 11 : i64} {
  func.func @_matmul_bias_add_ln_kernel(%arg0: i32, %arg1: i32, %arg2: memref<16x64xbf16, #tpu.memory_space<vmem>>, %arg3: memref<64x32xbf16, #tpu.memory_space<vmem>>, %arg4: memref<1x32xf32, #tpu.memory_space<vmem>>, %arg5: memref<16x32xbf16, #tpu.memory_space<vmem>>, %arg6: memref<1x32xf32, #tpu.memory_space<vmem>>, %arg7: memref<1x32xf32, #tpu.memory_space<vmem>>, %arg8: memref<16x32xf32, #tpu.memory_space<vmem>>, %arg9: memref<16x32xf32, #tpu.memory_space<vmem>>) attributes {dimension_semantics = [#tpu.dimension_semantics<parallel>, #tpu.dimension_semantics<arbitrary>], iteration_bounds = array<i64: 1, 1>, scalar_prefetch = 0 : i64, scratch_operands = 1 : i64, tpu.core_type = #tpu.core_type<tc>, window_params = [{transform_indices = @transform_0, window_bounds = array<i64: 16, 64>}, {transform_indices = @transform_1, window_bounds = array<i64: 64, 32>}, {pipeline_mode = #tpu.pipeline_mode<synchronous>, transform_indices = @transform_2, window_bounds = array<i64: 1, 32>}, {transform_indices = @transform_3, window_bounds = array<i64: 16, 32>}, {pipeline_mode = #tpu.pipeline_mode<synchronous>, transform_indices = @transform_4, window_bounds = array<i64: 1, 32>}, {pipeline_mode = #tpu.pipeline_mode<synchronous>, transform_indices = @transform_5, window_bounds = array<i64: 1, 32>}, {transform_indices = @transform_6, window_bounds = array<i64: 16, 32>}]} {
    %c0_i32 = arith.constant 0 : i32
    %0 = arith.cmpi eq, %arg1, %c0_i32 : i32
    %1 = arith.extui %0 : i1 to i32
    %c0_i32_0 = arith.constant 0 : i32
    %2 = arith.cmpi ne, %1, %c0_i32_0 : i32
    scf.if %2 {
      %cst_10 = arith.constant 0.000000e+00 : f32
      %12 = vector.broadcast %cst_10 : f32 to vector<16x32xf32>
      %c0_11 = arith.constant 0 : index
      %c0_12 = arith.constant 0 : index
      %13 = vector.load %arg9[%c0_11, %c0_12] : memref<16x32xf32, #tpu.memory_space<vmem>>, vector<16x32xf32>
      tpu.vector_store %arg9[%c0_11, %c0_12], %12 {strides = array<i32>} : memref<16x32xf32, #tpu.memory_space<vmem>>, vector<16x32xf32>,
    } else {
    }
    %c0 = arith.constant 0 : index
    %c0_1 = arith.constant 0 : index
    %3 = vector.load %arg9[%c0, %c0_1] : memref<16x32xf32, #tpu.memory_space<vmem>>, vector<16x32xf32>
    %c0_2 = arith.constant 0 : index
    %c0_3 = arith.constant 0 : index
    %4 = vector.load %arg2[%c0_2, %c0_3] : memref<16x64xbf16, #tpu.memory_space<vmem>>, vector<16x64xbf16>
    %c0_4 = arith.constant 0 : index
    %c0_5 = arith.constant 0 : index
    %5 = vector.load %arg3[%c0_4, %c0_5] : memref<64x32xbf16, #tpu.memory_space<vmem>>, vector<64x32xbf16>
    %cst = arith.constant dense<0.000000e+00> : vector<16x32xf32>
    %6 = tpu.matmul %4, %5, %cst {dimension_numbers = #tpu.dot_dimension_numbers<[1], [0], [0], [1], [0, 0, 1, 1], [], []>} : vector<16x64xbf16>, vector<64x32xbf16>, vector<16x32xf32> -> vector<16x32xf32>
    %7 = arith.addf %3, %6 : vector<16x32xf32>
    %c0_6 = arith.constant 0 : index
    %c0_7 = arith.constant 0 : index
    %8 = vector.load %arg9[%c0_6, %c0_7] : memref<16x32xf32, #tpu.memory_space<vmem>>, vector<16x32xf32>
    tpu.vector_store %arg9[%c0_6, %c0_7], %7 {strides = array<i32>} : memref<16x32xf32, #tpu.memory_space<vmem>>, vector<16x32xf32>,
    %c0_i32_8 = arith.constant 0 : i32
    %9 = arith.cmpi eq, %arg1, %c0_i32_8 : i32
    %10 = arith.extui %9 : i1 to i32
    %c0_i32_9 = arith.constant 0 : i32
    %11 = arith.cmpi ne, %10, %c0_i32_9 : i32
    scf.if %11 {
      %c0_10 = arith.constant 0 : index
      %c0_11 = arith.constant 0 : index
      %12 = vector.load %arg9[%c0_10, %c0_11] : memref<16x32xf32, #tpu.memory_space<vmem>>, vector<16x32xf32>
      %c0_12 = arith.constant 0 : index
      %c0_13 = arith.constant 0 : index
      %13 = vector.load %arg4[%c0_12, %c0_13] : memref<1x32xf32, #tpu.memory_space<vmem>>, vector<1x32xf32>
      %14 = vector.broadcast %13 : vector<1x32xf32> to vector<16x32xf32>
      %15 = arith.addf %12, %14 : vector<16x32xf32>
      %c0_14 = arith.constant 0 : index
      %c0_15 = arith.constant 0 : index
      %16 = vector.load %arg5[%c0_14, %c0_15] : memref<16x32xbf16, #tpu.memory_space<vmem>>, vector<16x32xbf16>
      %17 = arith.extf %16 : vector<16x32xbf16> to vector<16x32xf32>
      %18 = arith.addf %15, %17 : vector<16x32xf32>
      %cst_16 = arith.constant dense<0.000000e+00> : vector<16xf32>
      %19 = vector.multi_reduction <add>, %18, %cst_16 [1] : vector<16x32xf32> to vector<16xf32>
      %20 = vector.shape_cast %19 : vector<16xf32> to vector<16x1xf32>
      %cst_17 = arith.constant 3.200000e+01 : f32
      %21 = vector.broadcast %cst_17 : f32 to vector<16x1xf32>
      %22 = arith.divf %20, %21 : vector<16x1xf32>
      %23 = arith.mulf %18, %18 : vector<16x32xf32>
      %cst_18 = arith.constant dense<0.000000e+00> : vector<16xf32>
      %24 = vector.multi_reduction <add>, %23, %cst_18 [1] : vector<16x32xf32> to vector<16xf32>
      %25 = vector.shape_cast %24 : vector<16xf32> to vector<16x1xf32>
      %cst_19 = arith.constant 3.200000e+01 : f32
      %26 = vector.broadcast %cst_19 : f32 to vector<16x1xf32>
      %27 = arith.divf %25, %26 : vector<16x1xf32>
      %28 = arith.mulf %22, %22 : vector<16x1xf32>
      %29 = arith.subf %27, %28 : vector<16x1xf32>
      %cst_20 = arith.constant 0.000000e+00 : f32
      %30 = vector.broadcast %cst_20 : f32 to vector<16x1xf32>
      %31 = arith.maximumf %29, %30 : vector<16x1xf32>
      %32 = vector.broadcast %22 : vector<16x1xf32> to vector<16x32xf32>
      %33 = arith.subf %18, %32 : vector<16x32xf32>
      %cst_21 = arith.constant 9.99999974E-6 : f32
      %34 = vector.broadcast %cst_21 : f32 to vector<16x1xf32>
      %35 = arith.addf %31, %34 : vector<16x1xf32>
      %36 = math.rsqrt %35 : vector<16x1xf32>
      %37 = vector.broadcast %36 : vector<16x1xf32> to vector<16x32xf32>
      %38 = arith.mulf %33, %37 : vector<16x32xf32>
      %c0_22 = arith.constant 0 : index
      %c0_23 = arith.constant 0 : index
      %39 = vector.load %arg6[%c0_22, %c0_23] : memref<1x32xf32, #tpu.memory_space<vmem>>, vector<1x32xf32>
      %40 = vector.broadcast %39 : vector<1x32xf32> to vector<16x32xf32>
      %41 = arith.mulf %38, %40 : vector<16x32xf32>
      %c0_24 = arith.constant 0 : index
      %c0_25 = arith.constant 0 : index
      %42 = vector.load %arg7[%c0_24, %c0_25] : memref<1x32xf32, #tpu.memory_space<vmem>>, vector<1x32xf32>
      %43 = vector.broadcast %42 : vector<1x32xf32> to vector<16x32xf32>
      %44 = arith.addf %41, %43 : vector<16x32xf32>
      %c0_26 = arith.constant 0 : index
      %c0_27 = arith.constant 0 : index
      %45 = vector.load %arg8[%c0_26, %c0_27] : memref<16x32xf32, #tpu.memory_space<vmem>>, vector<16x32xf32>
      tpu.vector_store %arg8[%c0_26, %c0_27], %44 {strides = array<i32>} : memref<16x32xf32, #tpu.memory_space<vmem>>, vector<16x32xf32>,
    } else {
    }
    return
  }
  func.func @transform_0(%arg0: i32, %arg1: i32) -> (i32, i32) {
    %c0_i32 = arith.constant 0 : i32
    return %arg0, %arg1 : i32, i32
  }
  func.func @transform_1(%arg0: i32, %arg1: i32) -> (i32, i32) {
    %c0_i32 = arith.constant 0 : i32
    %c0_i32_0 = arith.constant 0 : i32
    return %arg1, %c0_i32 : i32, i32
  }
  func.func @transform_2(%arg0: i32, %arg1: i32) -> (i32, i32) {
    %c0_i32 = arith.constant 0 : i32
    %c0_i32_0 = arith.constant 0 : i32
    %c0_i32_1 = arith.constant 0 : i32
    return %c0_i32, %c0_i32_0 : i32, i32
  }
  func.func @transform_3(%arg0: i32, %arg1: i32) -> (i32, i32) {
    %c0_i32 = arith.constant 0 : i32
    %c0_i32_0 = arith.constant 0 : i32
    return %arg0, %c0_i32 : i32, i32
  }
  func.func @transform_4(%arg0: i32, %arg1: i32) -> (i32, i32) {
    %c0_i32 = arith.constant 0 : i32
    %c0_i32_0 = arith.constant 0 : i32
    %c0_i32_1 = arith.constant 0 : i32
    return %c0_i32, %c0_i32_0 : i32, i32
  }
  func.func @transform_5(%arg0: i32, %arg1: i32) -> (i32, i32) {
    %c0_i32 = arith.constant 0 : i32
    %c0_i32_0 = arith.constant 0 : i32
    %c0_i32_1 = arith.constant 0 : i32
    return %c0_i32, %c0_i32_0 : i32, i32
  }
  func.func @transform_6(%arg0: i32, %arg1: i32) -> (i32, i32) {
    %c0_i32 = arith.constant 0 : i32
    %c0_i32_0 = arith.constant 0 : i32
    return %arg0, %c0_i32 : i32, i32
  }
}

</mosaic_0001>

<bundles_post_ra>
// kernel: encoder_forward.12
= control target key start
LH: loop header
LB: loop body
LE: loop exit
PB: predicated region body
PF: predicated region fallthrough
CT: control target
= control target key end

     0   :  { %vm19_vm0 = vcmask 261120   ;;  %v150_v0 = vmov 0.0   ;;  %vm151_vm1 = vmmov 0   ;;  %vm118_vm2 = vcmask 257024   ;;  %s195_s1 = inlined_call_operand.vmem [shape: bf16[32,32], index: 1, kind: input, shape index: {}]   ;;  %s196_s0 = inlined_call_operand.vmem [shape: bf16[16,32], index: 0, kind: input, shape index: {}]   ;;  %s197_s2 = inlined_call_operand.vmem [shape: f32[1,32], index: 2, kind: input, shape index: {}]   ;;  %s198_s3 = inlined_call_operand.vmem [shape: bf16[16,32], index: 3, kind: output, shape index: {}]  }
   0x1   :  { %137 = vmatprep.subr.bf16.mxu0 %v150_v0  ;;  %v147_v1 = vld [vmem:[%s195_s1] sm:$0xff]   ;;  %141 = vmatprep.mubr.msk.bf16.mxu0 %vm151_vm1, %v150_v0  ;;  %20 = vst.msk [vmem:[#allocation2] sm:$0xff] %vm19_vm0, %v150_v0  ;;  %21 = vst.msk [vmem:[#allocation2 + $0x8] sm:$0xff] %vm19_vm0, %v150_v0  ;;  %v148_v2 = vld [vmem:[%s195_s1 + $0x8] sm:$0xff]  }
   0x2   :  { %138 = vmatpush3.bf16.msra.mxu0 %v147_v1  ;;  %v149_v3 = vld [vmem:[%s196_s0] sm:$0xff]  }
   0x3   :  { %139 = vmatprep.subr.bf16.mxu0 %v150_v0  ;;  %v129_v12 = vld [vmem:[%s197_s2] ss:$0 sm:$0xff] }
   0x6   :  { %140 = vmatpush3.bf16.msra.mxu0 %v148_v2 }
   0x8   :  { %v22_v4 = vld [vmem:[#allocation2] sm:$0xff]  ;;  %v23_v6 = vld [vmem:[#allocation2 + $0x8] sm:$0xff] }
   0x9   :  { %142 = vmatmul.mubr.msk.bf16.vlgmr.msra.gmra.mrb[0].mxu0 %vm19_vm0, %v149_v3 }
  0xdc   :  { %v85_v5 = vpop.f32.mrb[0].mxu0 }
  0xdd   :  { %v92_v7 = vadd.f32 %v85_v5, %v22_v4  ;;  %v143_v8 = vpop.f32.mrb[1].mxu0 }
  0xde   :  { %v88_v9 = vpop.f32.mrb[2].mxu0 }
  0xdf   :  { %94 = vst.msk [vmem:[#allocation2] sm:$0xff] %vm19_vm0, %v92_v7  ;;  %v93_v10 = vadd.f32 %v88_v9, %v23_v6  ;;  %v144_v11 = vpop.f32.mrb[3].mxu0 }
  0xe1   :  { %95 = vst.msk [vmem:[#allocation2 + $0x8] sm:$0xff] %vm19_vm0, %v93_v10 }
  0xe6   :  { %v99_v13 = vld [vmem:[#allocation2] sm:$0xff] }
  0xe7   :  { %v108_v14 = vadd.f32 %v129_v12, %v99_v13 }
  0xe8   :  { %v100_v15 = vld [vmem:[#allocation2 + $0x8] sm:$0xff] }
  0xe9   :  { %v132_v16 = vpack.c.bf16 %v108_v14, %v108_v14  ;;  %v109_v17 = vadd.f32 %v129_v12, %v100_v15 }
  0xeb   :  { %119 = vst.msk [vmem:[%s198_s3] sm:$0xf] %vm118_vm2, %v132_v16  ;;  %v133_v18 = vpack.c.bf16 %v109_v17, %v109_v17 }
  0xed   :  { %120 = vst.msk [vmem:[%s198_s3 + $0x4] sm:$0xf] %vm118_vm2, %v133_v18 }

// kernel: encoder_forward.13
= control target key start
LH: loop header
LB: loop body
LE: loop exit
PB: predicated region body
PF: predicated region fallthrough
CT: control target
= control target key end

     0   :  { %vm19_vm0 = vcmask 523264   ;;  %v151_v0 = vmov 0.0   ;;  %vm152_vm1 = vmmov 0   ;;  %vm47_vm2 = vcmask 261120   ;;  %s195_s1 = inlined_call_operand.vmem [shape: bf16[32,64], index: 1, kind: input, shape index: {}]   ;;  %s196_s0 = inlined_call_operand.vmem [shape: bf16[16,32], index: 0, kind: input, shape index: {}]   ;;  %s197_s2 = inlined_call_operand.vmem [shape: f32[1,64], index: 2, kind: input, shape index: {}]   ;;  %s198_s3 = inlined_call_operand.vmem [shape: bf16[16,64], index: 3, kind: output, shape index: {}]  }
   0x1   :  { %138 = vmatprep.subr.bf16.mxu0 %v151_v0  ;;  %v148_v1 = vld [vmem:[%s195_s1] sm:$0xff]   ;;  %142 = vmatprep.mubr.msk.bf16.mxu0 %vm152_vm1, %v151_v0  ;;  %20 = vst.msk [vmem:[#allocation2] sm:$0xff] %vm19_vm0, %v151_v0  ;;  %21 = vst.msk [vmem:[#allocation2 + $0x8] sm:$0xff] %vm19_vm0, %v151_v0  ;;  %v149_v2 = vld [vmem:[%s195_s1 + $0x8] sm:$0xff]   ;;  %vm119_vm3 = vcmask 519168  }
   0x2   :  { %139 = vmatpush3.bf16.msra.mxu0 %v148_v1  ;;  %v150_v3 = vld [vmem:[%s196_s0] sm:$0xff]  }
   0x3   :  { %140 = vmatprep.subr.bf16.mxu0 %v151_v0  ;;  %v130_v12 = vld [vmem:[%s197_s2] ss:$0 sm:$0xff] }
   0x6   :  { %141 = vmatpush3.bf16.msra.mxu0 %v149_v2 }
   0x8   :  { %v22_v4 = vld [vmem:[#allocation2] sm:$0xff]  ;;  %v23_v6 = vld [vmem:[#allocation2 + $0x8] sm:$0xff] }
   0x9   :  { %143 = vmatmul.mubr.msk.bf16.vlgmr.msra.gmra.mrb[0].mxu0 %vm47_vm2, %v150_v3 }
  0xdc   :  { %v85_v5 = vpop.f32.mrb[0].mxu0 }
  0xdd   :  { %v92_v7 = vadd.f32 %v85_v5, %v22_v4  ;;  %v144_v8 = vpop.f32.mrb[1].mxu0 }
  0xde   :  { %v88_v9 = vpop.f32.mrb[2].mxu0 }
  0xdf   :  { %95 = vst.msk [vmem:[#allocation2] sm:$0xff] %vm19_vm0, %v92_v7  ;;  %v93_v10 = vadd.f32 %v88_v9, %v23_v6  ;;  %v145_v11 = vpop.f32.mrb[3].mxu0 }
  0xe1   :  { %96 = vst.msk [vmem:[#allocation2 + $0x8] sm:$0xff] %vm19_vm0, %v93_v10 }
  0xe6   :  { %v100_v13 = vld [vmem:[#allocation2] sm:$0xff] }
  0xe7   :  { %v109_v14 = vadd.f32 %v130_v12, %v100_v13 }
  0xe8   :  { %v101_v15 = vld [vmem:[#allocation2 + $0x8] sm:$0xff] }
  0xe9   :  { %v133_v16 = vpack.c.bf16 %v109_v14, %v109_v14  ;;  %v110_v17 = vadd.f32 %v130_v12, %v101_v15 }
  0xeb   :  { %120 = vst.msk [vmem:[%s198_s3] sm:$0xf] %vm119_vm3, %v133_v16  ;;  %v134_v18 = vpack.c.bf16 %v110_v17, %v110_v17 }
  0xed   :  { %121 = vst.msk [vmem:[%s198_s3 + $0x4] sm:$0xf] %vm119_vm3, %v134_v18 }

// kernel: encoder_forward.15
= control target key start
LH: loop header
LB: loop body
LE: loop exit
PB: predicated region body
PF: predicated region fallthrough
CT: control target
= control target key end

     0   :  { %vm28_vm0 = vcmask 261120   ;;  %v226_v0 = vmov 0.0   ;;  %vm227_vm1 = vmmov 0   ;;  %vm184_vm2 = vcmask 257024   ;;  %s299_s1 = inlined_call_operand.vmem [shape: bf16[32,32], index: 1, kind: input, shape index: {}]   ;;  %s300_s0 = inlined_call_operand.vmem [shape: bf16[16,32], index: 0, kind: input, shape index: {}]   ;;  %s301_s3 = inlined_call_operand.vmem [shape: bf16[16,32], index: 3, kind: input, shape index: {}]   ;;  %s302_s2 = inlined_call_operand.vmem [shape: f32[1,32], index: 2, kind: input, shape index: {}]   ;;  %s303_s4 = inlined_call_operand.vmem [shape: f32[1,32], index: 4, kind: input, shape index: {}]   ;;  %s304_s5 = inlined_call_operand.vmem [shape: f32[1,32], index: 5, kind: input, shape index: {}]   ;;  %s305_s6 = inlined_call_operand.vmem [shape: bf16[16,32], index: 6, kind: output, shape index: {}]  }
   0x1   :  { %209 = vmatprep.subr.bf16.mxu0 %v226_v0  ;;  %v219_v1 = vld [vmem:[%s299_s1] sm:$0xff]   ;;  %213 = vmatprep.mubr.msk.bf16.mxu0 %vm227_vm1, %v226_v0  ;;  %29 = vst.msk [vmem:[#allocation2] sm:$0xff] %vm28_vm0, %v226_v0  ;;  %30 = vst.msk [vmem:[#allocation2 + $0x8] sm:$0xff] %vm28_vm0, %v226_v0  ;;  %v220_v2 = vld [vmem:[%s299_s1 + $0x8] sm:$0xff]  }
   0x2   :  { %210 = vmatpush3.bf16.msra.mxu0 %v219_v1  ;;  %v221_v3 = vld [vmem:[%s300_s0] sm:$0xff]  }
   0x3   :  { %211 = vmatprep.subr.bf16.mxu0 %v226_v0  ;;  %v203_v12 = vld [vmem:[%s301_s3] sm:$0xff]  }
   0x4   :  { %v195_v13 = vld [vmem:[%s302_s2] ss:$0 sm:$0xff]  ;;  %v204_v14 = vunpack.c.l.bf16 %v203_v12  ;;  %v205_v17 = vunpack.c.h.bf16 %v203_v12 }
   0x5   :  { %v196_v46 = vld [vmem:[%s303_s4] ss:$0 sm:$0xff] }
   0x6   :  { %212 = vmatpush3.bf16.msra.mxu0 %v220_v2  ;;  %v197_v48 = vld [vmem:[%s304_s5] ss:$0 sm:$0xff] }
   0x8   :  { %v31_v4 = vld [vmem:[#allocation2] sm:$0xff]  ;;  %v32_v6 = vld [vmem:[#allocation2 + $0x8] sm:$0xff] }
   0x9   :  { %214 = vmatmul.mubr.msk.bf16.vlgmr.msra.gmra.mrb[0].mxu0 %vm28_vm0, %v221_v3 }
  0xdc   :  { %v94_v5 = vpop.f32.mrb[0].mxu0 }
  0xdd   :  { %v101_v7 = vadd.f32 %v94_v5, %v31_v4  ;;  %v215_v8 = vpop.f32.mrb[1].mxu0 }
  0xde   :  { %v97_v9 = vpop.f32.mrb[2].mxu0 }
  0xdf   :  { %103 = vst.msk [vmem:[#allocation2] sm:$0xff] %vm28_vm0, %v101_v7  ;;  %v102_v10 = vadd.f32 %v97_v9, %v32_v6  ;;  %v216_v11 = vpop.f32.mrb[3].mxu0 }
  0xe1   :  { %104 = vst.msk [vmem:[#allocation2 + $0x8] sm:$0xff] %vm28_vm0, %v102_v10 }
  0xe6   :  { %v108_v15 = vld [vmem:[#allocation2] sm:$0xff] }
  0xe7   :  { %v117_v16 = vadd.f32 %v195_v13, %v108_v15 }
  0xe8   :  { %v109_v18 = vld [vmem:[#allocation2 + $0x8] sm:$0xff] }
  0xe9   :  { %v123_v19 = vadd.f32 %v204_v14, %v117_v16  ;;  %v118_v20 = vadd.f32 %v195_v13, %v109_v18 }
  0xeb   :  { %v125_v21 = vsel %vm28_vm0, %v123_v19, 0.0  ;;  %v134_v22 = vmul.f32 %v123_v19, %v123_v19  ;;  %v124_v23 = vadd.f32 %v205_v17, %v118_v20 }
  0xec   :  { %126 = vadd.xlane.f32.xlu0 %v125_v21 }
  0xed   :  { %v136_v24 = vsel %vm28_vm0, %v134_v22, 0.0  ;;  %v135_v25 = vmul.f32 %v124_v23, %v124_v23  ;;  %v128_v26 = vsel %vm28_vm0, %v124_v23, 0.0 }
  0xee   :  { %137 = vadd.xlane.f32.xlu1 %v136_v24 }
  0xef   :  { %v139_v27 = vsel %vm28_vm0, %v135_v25, 0.0 }
  0xf0   :  { %129 = vadd.xlane.f32.xlu0 %v128_v26 }
  0xf2   :  { %140 = vadd.xlane.f32.xlu1 %v139_v27 }
 0x179   :  { %v127_v28 = vpop.xlane.xlu0 %126 }
 0x17a   :  { %v132_v29 = vmul.f32 0.03125, %v127_v28 }
 0x17b   :  { %v138_v30 = vpop.xlane.xlu1 %137 }
 0x17c   :  { %v144_v31 = vmul.f32 %v132_v29, %v132_v29  ;;  %v142_v32 = vmul.f32 0.03125, %v138_v30  ;;  %v150_v44 = vsub.f32 %v123_v19, %v132_v29 }
 0x17d   :  { %v130_v33 = vpop.xlane.xlu0 %129 }
 0x17e   :  { %v146_v34 = vsub.f32 %v142_v32, %v144_v31  ;;  %v133_v35 = vmul.f32 0.03125, %v130_v33 }
 0x17f   :  { %v141_v36 = vpop.xlane.xlu1 %140 }
 0x180   :  { %v148_v37 = vmax.f32 %v146_v34, 0.0  ;;  %v145_v38 = vmul.f32 %v133_v35, %v133_v35  ;;  %v143_v39 = vmul.f32 0.03125, %v141_v36  ;;  %v151_v50 = vsub.f32 %v124_v23, %v133_v35 }
 0x182   :  { %v152_v40 = vadd.f32 1e-05, %v148_v37  ;;  %v147_v41 = vsub.f32 %v143_v39, %v145_v38 }
 0x184   :  { %222 = vrsqrt.f32 %v152_v40  ;;  %v149_v42 = vmax.f32 %v147_v41, 0.0 }
 0x186   :  { %v153_v43 = vadd.f32 1e-05, %v149_v42 }
 0x188   :  { %224 = vrsqrt.f32 %v153_v43 }
 0x18e   :  { %v223_v45 = vpop.eup %222 }
 0x18f   :  { %v156_v47 = vmul.f32 %v223_v45, %v150_v44 }
 0x191   :  { %v165_v49 = vmul.f32 %v196_v46, %v156_v47 }
 0x192   :  { %v225_v51 = vpop.eup %224 }
 0x193   :  { %v174_v52 = vadd.f32 %v197_v48, %v165_v49  ;;  %v157_v53 = vmul.f32 %v225_v51, %v151_v50 }
 0x195   :  { %v200_v54 = vpack.c.bf16 %v174_v52, %v174_v52  ;;  %v166_v55 = vmul.f32 %v196_v46, %v157_v53 }
 0x197   :  { %185 = vst.msk [vmem:[%s305_s6] sm:$0xf] %vm184_vm2, %v200_v54  ;;  %v175_v56 = vadd.f32 %v197_v48, %v166_v55 }
 0x199   :  { %v201_v57 = vpack.c.bf16 %v175_v56, %v175_v56 }
 0x19b   :  { %186 = vst.msk [vmem:[%s305_s6 + $0x4] sm:$0xf] %vm184_vm2, %v201_v57 }

// kernel: encoder_forward.14
= control target key start
LH: loop header
LB: loop body
LE: loop exit
PB: predicated region body
PF: predicated region fallthrough
CT: control target
= control target key end

     0   :  { %s1137_s9 = smov 0   ;;  %s1139_s10 = smov 0   ;;  %s1305_s0 = inlined_call_operand.vmem [shape: bf16[2,8,32], index: 0, kind: input, shape index: {}]   ;;  %s1306_s1 = inlined_call_operand.vmem [shape: bf16[2,8,64], index: 1, kind: input, shape index: {}]   ;;  %s1307_s2 = inlined_call_operand.vmem [shape: bf16[2,8,32], index: 2, kind: output, shape index: {}]  }
   0x1   :  { %s1141_s11 = smov 0  }
   0x2 LB: > { %s31_s12 = sadd.s32 1, %s1102_s10  ;;  %p934_p0 = scmp.ge.s32.totalorder %s1106_s11, 1  ;;  %s1106_s11 = sphi %s1141_s11, %s12_s11   ;;  %s1102_s10 = sphi %s1139_s10, %s1309_s10   ;;  %s1098_s9 = sphi %s1137_s9, %s1308_s9  }
   0x3   : > { %p33_p1 = scmp.ge.s32.totalorder %s31_s12, 2  ;;  %p151_p2 = scmp.lt.s32.totalorder %s1106_s11, 3 }
   0x5   : > { %s1311_s12 = smov (%p33_p1, %s31_s12), 0  ;;  %p152_p3 = pnand %p934_p0, %p151_p2 }
   0x6   : > { %p184_p4 = scmp.lt.s32.totalorder (!%p152_p3), %s1098_s9, 1  ;;  %vm219_vm0 = vcmask (!%p152_p3), 64512   ;;  %v1108_v0 = vmov (!%p152_p3), 0.0   ;;  %vm1109_vm1 = vmmov (!%p152_p3), 0   ;;  %vm210_vm2 = vcmask (!%p152_p3), 7168   ;;  %s1112_s20 = smov (!%p152_p3), 96  }
   0x7   : > { %155 = sbr.rel (%p152_p3) target bundleno = 1465 (0x5b9), region = 28  ;;  %971 = vmatprep.subr.bf16.mxu0 (!%p152_p3), %v1108_v0  ;;  %220 = vst.msk [vmem:[#allocation4] sm:$0xff] (!%p152_p3), %vm219_vm0, %v1108_v0  ;;  %221 = vst.msk [vmem:[#allocation4 + $0x8] sm:$0xff] (!%p152_p3), %vm219_vm0, %v1108_v0  ;;  %973 = vmatprep.mubr.msk.bf16.mxu0 (!%p152_p3), %vm1109_vm1, %v1108_v0  ;;  %v1110_v7 = vmov (!%p152_p3), -inf   ;;  %v1111_v13 = vmov (!%p152_p3), 0   ;;  %s1113_s21 = smov (!%p152_p3), 120  }
   0x8   : > { %222 = vst.msk [vmem:[#allocation4 + $0x10] sm:$0xff] (!%p152_p3), %vm219_vm0, %v1108_v0  ;;  %223 = vst.msk [vmem:[#allocation4 + $0x18] sm:$0xff] (!%p152_p3), %vm219_vm0, %v1108_v0  ;;  %977 = vmatprep.subr.bf16.mxu1 (!%p152_p3), %v1108_v0  ;;  %979 = vmatprep.mubr.msk.bf16.mxu1 (!%p152_p3), %vm1109_vm1, %v1108_v0  ;;  %s1114_s22 = smov (!%p152_p3), 112   ;;  %s1115_s23 = smov (!%p152_p3), 104   ;;  %vm316_vm3 = vcmask (!%p152_p3), 1043456   ;;  %vm782_vm4 = vcmask (!%p152_p3), 60416  }
   0x9   : > { %211 = vst.msk [vmem:[#allocation2] sm:$0xff] (!%p152_p3), %vm210_vm2, %v1110_v7  ;;  %212 = vst.msk [vmem:[#allocation2 + $0x8] sm:$0xff] (!%p152_p3), %vm210_vm2, %v1110_v7  ;;  %1057 = vset.pattern.permute.xlu0 (!%p152_p3), %v1111_v13  ;;  %1058 = vset.pattern.permute.xlu1 (!%p152_p3), %v1111_v13  ;;  %s1116_s24 = smov (!%p152_p3), 88   ;;  %s1117_s25 = smov (!%p152_p3), 80   ;;  %vm800_vm5 = vcmask (!%p152_p3), 126016   ;;  %vm818_vm6 = vcmask (!%p152_p3), 191616  }
   0xa   : > { %213 = vst.msk [vmem:[#allocation2 + $0x10] sm:$0xff] (!%p152_p3), %vm210_vm2, %v1110_v7  ;;  %214 = vst.msk [vmem:[#allocation2 + $0x18] sm:$0xff] (!%p152_p3), %vm210_vm2, %v1110_v7  ;;  %s1118_s26 = smov (!%p152_p3), 72   ;;  %s1119_s30 = smov (!%p152_p3), 8   ;;  %vm836_vm7 = vcmask (!%p152_p3), 257216  }
   0xb   : > { %215 = vst.msk [vmem:[#allocation3] sm:$0xff] (!%p152_p3), %vm210_vm2, %v1108_v0  ;;  %216 = vst.msk [vmem:[#allocation3 + $0x8] sm:$0xff] (!%p152_p3), %vm210_vm2, %v1108_v0  ;;  %s1120_s3 = smov (!%p152_p3), 16   ;;  %s1121_s4 = smov (!%p152_p3), 24  }
   0xc   : > { %217 = vst.msk [vmem:[#allocation3 + $0x10] sm:$0xff] (!%p152_p3), %vm210_vm2, %v1108_v0  ;;  %218 = vst.msk [vmem:[#allocation3 + $0x18] sm:$0xff] (!%p152_p3), %vm210_vm2, %v1108_v0 }
   0xe   : > { %s1313_s9 = smov (!%p184_p4, %s1098_s9), 1 }
   0xf   : > { %s1169_s13 = sshll.u32 %s1313_s9, 2 }
  0x10   : > { %s190_s16 = scalar_lea.vmem %s1305_s0, %s1169_s13  ;;  %s197_s19 = scalar_lea.vmem %s1306_s1, %s1169_s13  ;;  %v1203_v15 = vld [vmem:[#allocation2] sm:$0xff]  ;;  %v1239_v54 = vld [vmem:[#allocation2 + $0x8] sm:$0xff] }
  0x11   : > { %v224_v1 = vld [vmem:[%s190_s16] sm:$0xf]  ;;  %v550_v58 = vld [vmem:[#allocation2 + $0x10] sm:$0xff]  ;;  %v685_v62 = vld [vmem:[#allocation2 + $0x18] sm:$0xff]  ;;  %s1287_s29 = scalar_lea.vmem %s1307_s2, %s1169_s13 }
  0x12   : > { %v225_v2 = vld [vmem:[%s197_s19] sm:$0xf]  ;;  %v226_v3 = vunpack.c.l.bf16 %v224_v1 }
  0x13   : > { %v234_v4 = vsel %vm219_vm0, %v225_v2, 0  ;;  %v1197_v14 = vcombine.low %v225_v2, %v225_v2 }
  0x14   : > { %972 = vmatpush3.bf16.xpose.msra.mxu0 %v234_v4  ;;  %v227_v5 = vmul.f32 0.35355338, %v226_v3 }
  0x15   : > { %989 = vmatprep.subr.bf16.mxu0 %v1108_v0  ;;  %311 = vrot.lane.b32.xlu1 %v1197_v14, %s1112_s20 }
  0x16   : > { %v228_v6 = vpack.c.bf16 %v227_v5, %v227_v5 }
  0x19   : > { %366 = vrot.lane.b32.xlu1 %v1197_v14, %s1113_s21 }
  0x1b   : > { %974 = vmatmul.mubr.msk.bf16.vlgmr.msra.gmra.mrb[0].mxu0 %vm219_vm0, %v228_v6 }
  0x1c   : > { %991 = vmatprep.mubr.msk.bf16.mxu0 %vm1109_vm1, %v1108_v0 }
  0x1d   : > { %364 = vrot.lane.b32.xlu1 %v228_v6, %s1113_s21 }
  0x21   : > { %501 = vrot.lane.b32.xlu1 %v1197_v14, %s1114_s22 }
  0x25   : > { %499 = vrot.lane.b32.xlu1 %v228_v6, %s1114_s22 }
  0x29   : > { %636 = vrot.lane.b32.xlu1 %v1197_v14, %s1115_s23 }
  0x2d   : > { %634 = vrot.lane.b32.xlu1 %v228_v6, %s1115_s23 }
  0x87   : > { %v312_v19 = vpop.permute.xlu1 %311 }
  0x88   : > { %v318_v20 = vsel %vm316_vm3, %v312_v19, 0 }
  0x89   : > { %978 = vmatpush3.bf16.msra.mxu1 %v318_v20 }
  0x8a   : > { %983 = vmatprep.subr.bf16.mxu1 %v1108_v0 }
  0x8b   : > { %v367_v24 = vpop.permute.xlu1 %366 }
  0x8c   : > { %v372_v27 = vsel %vm219_vm0, %v367_v24, 0 }
  0x8f   : > { %v365_v25 = vpop.permute.xlu1 %364 }
  0x93   : > { %v502_v29 = vpop.permute.xlu1 %501 }
  0x94   : > { %v507_v31 = vsel %vm219_vm0, %v502_v29, 0 }
  0x97   : > { %v500_v30 = vpop.permute.xlu1 %499 }
  0x9b   : > { %v637_v32 = vpop.permute.xlu1 %636 }
  0x9c   : > { %v642_v33 = vsel %vm219_vm0, %v637_v32, 0 }
  0x9f   : > { %v635_v34 = vpop.permute.xlu1 %634 }
  0xee   : > { %v270_v8 = vpop.f32.mrb[0].mxu0 }
  0xef   : > { %v975_v9 = vpop.f32.mrb[1].mxu0  ;;  %v277_v10 = vsel %vm219_vm0, %v270_v8, -inf }
  0xf0   : > { %278 = vmax.xlane.f32.xlu0 %v277_v10  ;;  %v273_v11 = vpop.f32.mrb[2].mxu0 }
  0xf1   : > { %v976_v12 = vpop.f32.mrb[3].mxu0 }
 0x17d   : > { %v279_v16 = vpop.xlane.xlu0 %278 }
 0x17e   : > { %v1206_v17 = vmax.f32 %v1203_v15, %v279_v16 }
 0x180   : > { %v281_v18 = vsub.f32 %v1203_v15, %v1206_v17  ;;  %362 = vst.msk [vmem:[#allocation2] sm:$0xff] %vm210_vm2, %v1206_v17  ;;  %286 = vperm.xlu0 %1057, %v1206_v17  }
 0x1ff   : > { %v287_v21 = vpop.permute.xlu0 %286 }
 0x200   : > { %v289_v22 = vsub.f32 %v270_v8, %v287_v21 }
 0x202   : > { %v290_v23 = vmul.f32 1.442695, %v289_v22 }
 0x204   : > { %1060 = vpow2.f32 %v290_v23 }
 0x20e   : > { %v1215_v26 = vpop.eup %1060 }
 0x20f   : > { %v307_v28 = vpack.c.bf16 %v1215_v26, %v1215_v26  ;;  %v294_v3 = vsel %vm219_vm0, %v1215_v26, 0.0 }
 0x211   : > { %980 = vmatmul.mubr.msk.bf16.vlgmr.msra.gmra.mrb[0].mxu1 %vm219_vm0, %v307_v28 }
 0x212   : > { %984 = vmatpush3.bf16.xpose.msra.mxu1 %v372_v27  ;;  %985 = vmatprep.mubr.msk.bf16.mxu1 %vm1109_vm1, %v1108_v0 }
 0x213   : > { %995 = vmatprep.subr.bf16.mxu1 %v1108_v0 }
 0x219   : > { %986 = vmatmul.mubr.msk.bf16.vlgmr.msra.gmra.mrb[4].mxu1 %vm219_vm0, %v365_v25 }
 0x21a   : > { %996 = vmatpush3.bf16.xpose.msra.mxu1 %v507_v31  ;;  %997 = vmatprep.mubr.msk.bf16.mxu1 %vm1109_vm1, %v1108_v0 }
 0x21b   : > { %1007 = vmatprep.subr.bf16.mxu1 %v1108_v0 }
 0x221   : > { %998 = vmatmul.mubr.msk.bf16.vlgmr.msra.gmra.mrb[8].mxu1 %vm219_vm0, %v500_v30 }
 0x222   : > { %1008 = vmatpush3.bf16.xpose.msra.mxu1 %v642_v33  ;;  %1009 = vmatprep.mubr.msk.bf16.mxu1 %vm1109_vm1, %v1108_v0 }
 0x229   : > { %1010 = vmatmul.mubr.msk.bf16.vlgmr.msra.gmra.mrb[12].mxu1 %vm219_vm0, %v635_v34 }
 0x2e4   : > { %v1234_v35 = vpop.f32.mrb[0].mxu1 }
 0x2e5   : > { %v981_v36 = vpop.f32.mrb[1].mxu1 }
 0x2e6   : > { %v357_v37 = vpop.f32.mrb[2].mxu1  ;;  %v292_v36 = vld [vmem:[#allocation3] sm:$0xff] }
 0x2e7   : > { %v982_v38 = vpop.f32.mrb[3].mxu1 }
 0x2ec   : > { %v408_v39 = vpop.f32.mrb[4].mxu1 }
 0x2ed   : > { %v987_v40 = vpop.f32.mrb[5].mxu1  ;;  %v416_v41 = vsel %vm219_vm0, %v408_v39, -inf }
 0x2ee   : > { %417 = vmax.xlane.f32.xlu1 %v416_v41  ;;  %v411_v42 = vpop.f32.mrb[6].mxu1 }
 0x2ef   : > { %v988_v43 = vpop.f32.mrb[7].mxu1  ;;  %v432_v42 = vld [vmem:[#allocation3 + $0x8] sm:$0xff] }
 0x2f4   : > { %v543_v44 = vpop.f32.mrb[8].mxu1 }
 0x2f5   : > { %v999_v45 = vpop.f32.mrb[9].mxu1  ;;  %v551_v46 = vsel %vm219_vm0, %v543_v44, -inf }
 0x2f6   : > { %552 = vmax.xlane.f32.xlu0 %v551_v46  ;;  %v546_v47 = vpop.f32.mrb[10].mxu1  ;;  %v300_v46 = vld [vmem:[#allocation4] sm:$0xff] }
 0x2f7   : > { %v1000_v48 = vpop.f32.mrb[11].mxu1 }
 0x2f8   : > { %v567_v48 = vld [vmem:[#allocation3 + $0x10] sm:$0xff] }
 0x2fc   : > { %v678_v49 = vpop.f32.mrb[12].mxu1 }
 0x2fd   : > { %v1011_v50 = vpop.f32.mrb[13].mxu1  ;;  %v686_v51 = vsel %vm219_vm0, %v678_v49, -inf }
 0x2fe   : > { %687 = vmax.xlane.f32.xlu1 %v686_v51  ;;  %v681_v52 = vpop.f32.mrb[14].mxu1 }
 0x2ff   : > { %v1012_v53 = vpop.f32.mrb[15].mxu1 }
 0x37b   : > { %v418_v55 = vpop.xlane.xlu1 %417 }
 0x37c   : > { %v1242_v56 = vmax.f32 %v1239_v54, %v418_v55  ;;  %v702_v55 = vld [vmem:[#allocation3 + $0x18] sm:$0xff] }
 0x37e   : > { %v420_v57 = vsub.f32 %v1239_v54, %v1242_v56  ;;  %498 = vst.msk [vmem:[#allocation2 + $0x8] sm:$0xff] %vm210_vm2, %v1242_v56  ;;  %425 = vperm.xlu1 %1058, %v1242_v56  }
 0x380   : > { %v421_v33 = vmul.f32 1.442695, %v420_v57 }
 0x383   : > { %v553_v59 = vpop.xlane.xlu0 %552 }
 0x384   : > { %v554_v60 = vmax.f32 %v550_v58, %v553_v59 }
 0x386   : > { %v555_v61 = vsub.f32 %v550_v58, %v554_v60  ;;  %633 = vst.msk [vmem:[#allocation2 + $0x10] sm:$0xff] %vm210_vm2, %v554_v60  ;;  %560 = vperm.xlu0 %1057, %v554_v60  }
 0x388   : > { %v556_v22 = vmul.f32 1.442695, %v555_v61 }
 0x38b   : > { %v688_v63 = vpop.xlane.xlu1 %687 }
 0x38c   : > { %v689_v1 = vmax.f32 %v685_v62, %v688_v63 }
 0x38e   : > { %v690_v2 = vsub.f32 %v685_v62, %v689_v1  ;;  %768 = vst.msk [vmem:[#allocation2 + $0x18] sm:$0xff] %vm210_vm2, %v689_v1  ;;  %695 = vperm.xlu1 %1058, %v689_v1  }
 0x390   : > { %v691_v17 = vmul.f32 1.442695, %v690_v2 }
 0x392   : > { %448 = vrot.lane.b32.xlu1 %v1197_v14, %s1116_s24 }
 0x396   : > { %583 = vrot.lane.b32.xlu1 %v1197_v14, %s1117_s25 }
 0x39a   : > { %718 = vrot.lane.b32.xlu1 %v1197_v14, %s1118_s26  ;;  %v282_v14 = vmul.f32 1.442695, %v281_v18 }
 0x3a5   : > { %295 = vadd.xlane.f32.xlu0 %v294_v3 }
 0x3fd   : > { %v426_v4 = vpop.permute.xlu1 %425 }
 0x3fe   : > { %v428_v5 = vsub.f32 %v408_v39, %v426_v4 }
 0x400   : > { %v429_v6 = vmul.f32 1.442695, %v428_v5  ;;  %v440_v5 = vld [vmem:[#allocation4 + $0x8] sm:$0xff] }
 0x402   : > { %1062 = vpow2.f32 %v429_v6 }
 0x405   : > { %v561_v7 = vpop.permute.xlu0 %560 }
 0x406   : > { %v563_v8 = vsub.f32 %v543_v44, %v561_v7 }
 0x408   : > { %v564_v9 = vmul.f32 1.442695, %v563_v8 }
 0x40a   : > { %1064 = vpow2.f32 %v564_v9 }
 0x40c   : > { %v1063_v10 = vpop.eup %1062 }
 0x40d   : > { %v696_v11 = vpop.permute.xlu1 %695  ;;  %v434_v12 = vsel %vm219_vm0, %v1063_v10, 0.0  ;;  %v447_v23 = vpack.c.bf16 %v1063_v10, %v1063_v10 }
 0x40e   : > { %v698_v13 = vsub.f32 %v678_v49, %v696_v11  ;;  %435 = vadd.xlane.f32.xlu1 %v434_v12  ;;  %v575_v12 = vld [vmem:[#allocation4 + $0x10] sm:$0xff] }
 0x410   : > { %v699_v16 = vmul.f32 1.442695, %v698_v13 }
 0x411   : > { %v449_v19 = vpop.permute.xlu1 %448 }
 0x412   : > { %1066 = vpow2.f32 %v699_v16  ;;  %v454_v20 = vsel %vm316_vm3, %v449_v19, 0 }
 0x413   : > { %990 = vmatpush3.bf16.msra.mxu0 %v454_v20  ;;  %1068 = vpow2.f32 %v282_v14 }
 0x414   : > { %v1065_v21 = vpop.eup %1064  ;;  %1001 = vmatprep.subr.bf16.mxu0 %v1108_v0  ;;  %1070 = vpow2.f32 %v556_v22 }
 0x415   : > { %v569_v24 = vsel %vm219_vm0, %v1065_v21, 0.0  ;;  %v584_v25 = vpop.permute.xlu1 %583  ;;  %1072 = vpow2.f32 %v691_v17  ;;  %v582_v27 = vpack.c.bf16 %v1065_v21, %v1065_v21 }
 0x416   : > { %992 = vmatmul.mubr.msk.bf16.vlgmr.msra.gmra.mrb[4].mxu0 %vm219_vm0, %v447_v23  ;;  %570 = vadd.xlane.f32.xlu0 %v569_v24  ;;  %v589_v15 = vsel %vm316_vm3, %v584_v25, 0  ;;  %1074 = vpow2.f32 %v421_v33  ;;  %v710_v23 = vld [vmem:[#allocation4 + $0x18] sm:$0xff] }
 0x417   : > { %1002 = vmatpush3.bf16.msra.mxu0 %v589_v15  ;;  %1003 = vmatprep.mubr.msk.bf16.mxu0 %vm1109_vm1, %v1108_v0 }
 0x418   : > { %1013 = vmatprep.subr.bf16.mxu0 %v1108_v0 }
 0x419   : > { %v719_v18 = vpop.permute.xlu1 %718 }
 0x41a   : > { %v724_v28 = vsel %vm316_vm3, %v719_v18, 0 }
 0x41c   : > { %v1067_v26 = vpop.eup %1066 }
 0x41d   : > { %v704_v29 = vsel %vm219_vm0, %v1067_v26, 0.0  ;;  %v1069_v30 = vpop.eup %1068  ;;  %v717_v32 = vpack.c.bf16 %v1067_v26, %v1067_v26 }
 0x41e   : > { %1004 = vmatmul.mubr.msk.bf16.vlgmr.msra.gmra.mrb[8].mxu0 %vm219_vm0, %v582_v27  ;;  %705 = vadd.xlane.f32.xlu0 %v704_v29  ;;  %v1071_v31 = vpop.eup %1070  ;;  %v293_v37 = vmul.f32 %v1069_v30, %v292_v36 }
 0x41f   : > { %303 = vperm.xlu1 %1058, %v1069_v30   ;;  %1014 = vmatpush3.bf16.msra.mxu0 %v724_v28  ;;  %v1073_v34 = vpop.eup %1072  ;;  %v568_v51 = vmul.f32 %v1071_v31, %v567_v48 }
 0x420   : > { %1015 = vmatprep.mubr.msk.bf16.mxu0 %vm1109_vm1, %v1108_v0  ;;  %v1075_v39 = vpop.eup %1074  ;;  %v703_v56 = vmul.f32 %v1073_v34, %v702_v55 }
 0x421   : > { %v433_v43 = vmul.f32 %v1075_v39, %v432_v42 }
 0x423   : > { %578 = vperm.xlu1 %1058, %v1071_v31  }
 0x426   : > { %1016 = vmatmul.mubr.msk.bf16.vlgmr.msra.gmra.mrb[12].mxu0 %vm219_vm0, %v717_v32 }
 0x427   : > { %713 = vperm.xlu1 %1058, %v1073_v34  }
 0x432   : > { %v296_v38 = vpop.xlane.xlu0 %295 }
 0x433   : > { %v297_v40 = vadd.f32 %v296_v38, %v293_v37 }
 0x434   : > { %443 = vperm.xlu0 %1057, %v1075_v39  }
 0x435   : > { %299 = vst.msk [vmem:[#allocation3] sm:$0xff] %vm210_vm2, %v297_v40 }
 0x43c   : > { %v772_v0 = vld [vmem:[#allocation3] sm:$0xff] }
 0x43d   : > { %1076 = vrcp.f32 %v772_v0 }
 0x447   : > { %v1077_v41 = vpop.eup %1076 }
 0x448   : > { %777 = vperm.xlu0 %1057, %v1077_v41  }
 0x49b   : > { %v436_v44 = vpop.xlane.xlu1 %435 }
 0x49c   : > { %v437_v45 = vadd.f32 %v436_v44, %v433_v43 }
 0x49e   : > { %438 = vst.msk [vmem:[#allocation3 + $0x8] sm:$0xff] %vm210_vm2, %v437_v45 }
 0x49f   : > { %v304_v47 = vpop.permute.xlu1 %303 }
 0x4a0   : > { %v306_v49 = vmul.f32 %v304_v47, %v300_v46 }
 0x4a2   : > { %v360_v50 = vadd.f32 %v1234_v35, %v306_v49 }
 0x4a3   : > { %v571_v52 = vpop.xlane.xlu0 %570  ;;  %v579_v13 = vpop.permute.xlu1 %578 }
 0x4a4   : > { %361 = vst.msk [vmem:[#allocation4] sm:$0xff] %vm219_vm0, %v360_v50  ;;  %v572_v53 = vadd.f32 %v571_v52, %v568_v51  ;;  %v581_v14 = vmul.f32 %v579_v13, %v575_v12 }
 0x4a5   : > { %v784_v54 = vld [vmem:[#allocation3 + $0x8] sm:$0xff] }
 0x4a6   : > { %573 = vst.msk [vmem:[#allocation3 + $0x10] sm:$0xff] %vm210_vm2, %v572_v53  ;;  %1078 = vrcp.f32 %v784_v54 }
 0x4a7   : > { %v714_v24 = vpop.permute.xlu1 %713 }
 0x4a8   : > { %v716_v25 = vmul.f32 %v714_v24, %v710_v23 }
 0x4ab   : > { %v706_v57 = vpop.xlane.xlu0 %705  ;;  %v774_v1 = vld [vmem:[#allocation4] sm:$0xff] }
 0x4ac   : > { %v707_v58 = vadd.f32 %v706_v57, %v703_v56 }
 0x4ad   : > { %v802_v59 = vld [vmem:[#allocation3 + $0x10] sm:$0xff] }
 0x4ae   : > { %708 = vst.msk [vmem:[#allocation3 + $0x18] sm:$0xff] %vm210_vm2, %v707_v58  ;;  %1080 = vrcp.f32 %v802_v59 }
 0x4b0   : > { %v1079_v60 = vpop.eup %1078 }
 0x4b1   : > { %789 = vperm.xlu1 %1058, %v1079_v60  }
 0x4b3   : > { %v444_v63 = vpop.permute.xlu0 %443 }
 0x4b4   : > { %v446_v6 = vmul.f32 %v444_v63, %v440_v5 }
 0x4b5   : > { %v820_v35 = vld [vmem:[#allocation3 + $0x18] sm:$0xff] }
 0x4b6   : > { %1082 = vrcp.f32 %v820_v35 }
 0x4b8   : > { %v1081_v61 = vpop.eup %1080 }
 0x4b9   : > { %807 = vperm.xlu1 %1058, %v1081_v61  }
 0x4c0   : > { %v1083_v62 = vpop.eup %1082 }
 0x4c1   : > { %825 = vperm.xlu1 %1058, %v1083_v62  }
 0x4c7   : > { %v778_v2 = vpop.permute.xlu0 %777 }
 0x4c8   : > { %v780_v3 = vmul.f32 %v778_v2, %v774_v1 }
 0x4ca   : > { %v781_v4 = vpack.c.bf16 %v780_v3, %v780_v3 }
 0x4cc   : > { %783 = vst.msk [vmem:[%s1287_s29] sm:$0xf] %vm782_vm4, %v781_v4 }
 0x4e9   : > { %v490_v7 = vpop.f32.mrb[4].mxu0 }
 0x4ea   : > { %v496_v8 = vadd.f32 %v490_v7, %v446_v6  ;;  %v993_v9 = vpop.f32.mrb[5].mxu0 }
 0x4eb   : > { %v493_v10 = vpop.f32.mrb[6].mxu0 }
 0x4ec   : > { %497 = vst.msk [vmem:[#allocation4 + $0x8] sm:$0xff] %vm219_vm0, %v496_v8  ;;  %v994_v11 = vpop.f32.mrb[7].mxu0 }
 0x4f1   : > { %v625_v16 = vpop.f32.mrb[8].mxu0 }
 0x4f2   : > { %v631_v19 = vadd.f32 %v625_v16, %v581_v14  ;;  %v1005_v20 = vpop.f32.mrb[9].mxu0 }
 0x4f3   : > { %v628_v21 = vpop.f32.mrb[10].mxu0  ;;  %v786_v29 = vld [vmem:[#allocation4 + $0x8] sm:$0xff] }
 0x4f4   : > { %632 = vst.msk [vmem:[#allocation4 + $0x10] sm:$0xff] %vm219_vm0, %v631_v19  ;;  %v1006_v22 = vpop.f32.mrb[11].mxu0 }
 0x4f9   : > { %v760_v15 = vpop.f32.mrb[12].mxu0 }
 0x4fa   : > { %v766_v17 = vadd.f32 %v760_v15, %v716_v25  ;;  %v1017_v18 = vpop.f32.mrb[13].mxu0 }
 0x4fb   : > { %v763_v26 = vpop.f32.mrb[14].mxu0  ;;  %v804_v33 = vld [vmem:[#allocation4 + $0x10] sm:$0xff] }
 0x4fc   : > { %767 = vst.msk [vmem:[#allocation4 + $0x18] sm:$0xff] %vm219_vm0, %v766_v17  ;;  %v1018_v27 = vpop.f32.mrb[15].mxu0 }
 0x503   : > { %v822_v38 = vld [vmem:[#allocation4 + $0x18] sm:$0xff] }
 0x530   : > { %v790_v28 = vpop.permute.xlu1 %789 }
 0x531   : > { %v792_v30 = vmul.f32 %v790_v28, %v786_v29 }
 0x533   : > { %v952_v31 = vpack.c.bf16 %v792_v30, %v792_v30 }
 0x535   : > { %797 = vrot.lane.b32.xlu0 %v952_v31, %s1119_s30 }
 0x538   : > { %v808_v32 = vpop.permute.xlu1 %807 }
 0x539   : > { %v810_v34 = vmul.f32 %v808_v32, %v804_v33 }
 0x53b   : > { %v953_v36 = vpack.c.bf16 %v810_v34, %v810_v34 }
 0x53d   : > { %815 = vrot.lane.b32.xlu0 %v953_v36, %s1120_s3 }
 0x540   : > { %v826_v37 = vpop.permute.xlu1 %825 }
 0x541   : > { %v828_v39 = vmul.f32 %v826_v37, %v822_v38 }
 0x543   : > { %v954_v40 = vpack.c.bf16 %v828_v39, %v828_v39 }
 0x545   : > { %833 = vrot.lane.b32.xlu0 %v954_v40, %s1121_s4 }
 0x5a7   : > { %v798_v0 = vpop.permute.xlu0 %797 }
 0x5a8   : > { %801 = vst.msk [vmem:[%s1287_s29] sm:$0xf] %vm800_vm5, %v798_v0 }
 0x5af   : > { %v816_v41 = vpop.permute.xlu0 %815 }
 0x5b0   : > { %819 = vst.msk [vmem:[%s1287_s29] sm:$0xf] %vm818_vm6, %v816_v41 }
 0x5b7   : > { %v834_v42 = vpop.permute.xlu0 %833 }
 0x5b8   : > { %837 = vst.msk [vmem:[%s1287_s29] sm:$0xf] %vm836_vm7, %v834_v42 }
 0x5b9 PF: > { %s12_s11 = sadd.s32 1, %s1106_s11   ;;  %s1308_s9 = smov %s1102_s10 }
 0x5ba   : > { %p9_p5 = scmp.ge.s32.totalorder %s12_s11, 4   ;;  %s1309_s10 = smov %s1311_s12 }
 0x5bc   :  { %11 = sbr.rel (!%p9_p5) target bundleno = 2 (0x2), region = 78 }

// kernel: encoder_forward.16
= control target key start
LH: loop header
LB: loop body
LE: loop exit
PB: predicated region body
PF: predicated region fallthrough
CT: control target
= control target key end

     0   :  { %vm19_vm0 = vcmask 523264   ;;  %v153_v0 = vmov 0.0   ;;  %vm154_vm1 = vmmov 0   ;;  %vm47_vm2 = vcmask 261120   ;;  %s197_s1 = inlined_call_operand.vmem [shape: bf16[32,64], index: 1, kind: input, shape index: {}]   ;;  %s198_s0 = inlined_call_operand.vmem [shape: bf16[16,32], index: 0, kind: input, shape index: {}]   ;;  %s199_s2 = inlined_call_operand.vmem [shape: f32[1,64], index: 2, kind: input, shape index: {}]   ;;  %s200_s3 = inlined_call_operand.vmem [shape: bf16[16,64], index: 3, kind: output, shape index: {}]  }
   0x1   :  { %140 = vmatprep.subr.bf16.mxu0 %v153_v0  ;;  %v150_v1 = vld [vmem:[%s197_s1] sm:$0xff]   ;;  %144 = vmatprep.mubr.msk.bf16.mxu0 %vm154_vm1, %v153_v0  ;;  %20 = vst.msk [vmem:[#allocation2] sm:$0xff] %vm19_vm0, %v153_v0  ;;  %21 = vst.msk [vmem:[#allocation2 + $0x8] sm:$0xff] %vm19_vm0, %v153_v0  ;;  %v151_v2 = vld [vmem:[%s197_s1 + $0x8] sm:$0xff]   ;;  %vm121_vm3 = vcmask 519168  }
   0x2   :  { %141 = vmatpush3.bf16.msra.mxu0 %v150_v1  ;;  %v152_v3 = vld [vmem:[%s198_s0] sm:$0xff]  }
   0x3   :  { %142 = vmatprep.subr.bf16.mxu0 %v153_v0  ;;  %v132_v12 = vld [vmem:[%s199_s2] ss:$0 sm:$0xff] }
   0x6   :  { %143 = vmatpush3.bf16.msra.mxu0 %v151_v2 }
   0x8   :  { %v22_v4 = vld [vmem:[#allocation2] sm:$0xff]  ;;  %v23_v6 = vld [vmem:[#allocation2 + $0x8] sm:$0xff] }
   0x9   :  { %145 = vmatmul.mubr.msk.bf16.vlgmr.msra.gmra.mrb[0].mxu0 %vm47_vm2, %v152_v3 }
  0xdc   :  { %v85_v5 = vpop.f32.mrb[0].mxu0 }
  0xdd   :  { %v92_v7 = vadd.f32 %v85_v5, %v22_v4  ;;  %v146_v8 = vpop.f32.mrb[1].mxu0 }
  0xde   :  { %v88_v9 = vpop.f32.mrb[2].mxu0 }
  0xdf   :  { %95 = vst.msk [vmem:[#allocation2] sm:$0xff] %vm19_vm0, %v92_v7  ;;  %v93_v10 = vadd.f32 %v88_v9, %v23_v6  ;;  %v147_v11 = vpop.f32.mrb[3].mxu0 }
  0xe1   :  { %96 = vst.msk [vmem:[#allocation2 + $0x8] sm:$0xff] %vm19_vm0, %v93_v10 }
  0xe6   :  { %v100_v13 = vld [vmem:[#allocation2] sm:$0xff] }
  0xe7   :  { %v109_v14 = vadd.f32 %v132_v12, %v100_v13 }
  0xe8   :  { %v101_v15 = vld [vmem:[#allocation2 + $0x8] sm:$0xff] }
  0xe9   :  { %v111_v16 = vmax.f32 %v109_v14, 0.0  ;;  %v110_v17 = vadd.f32 %v132_v12, %v101_v15 }
  0xeb   :  { %v135_v18 = vpack.c.bf16 %v111_v16, %v111_v16  ;;  %v112_v19 = vmax.f32 %v110_v17, 0.0 }
  0xed   :  { %122 = vst.msk [vmem:[%s200_s3] sm:$0xf] %vm121_vm3, %v135_v18  ;;  %v136_v20 = vpack.c.bf16 %v112_v19, %v112_v19 }
  0xef   :  { %123 = vst.msk [vmem:[%s200_s3 + $0x4] sm:$0xf] %vm121_vm3, %v136_v20 }

// kernel: encoder_forward.17
= control target key start
LH: loop header
LB: loop body
LE: loop exit
PB: predicated region body
PF: predicated region fallthrough
CT: control target
= control target key end

     0   :  { %vm28_vm0 = vcmask 261120   ;;  %v253_v0 = vmov 0.0   ;;  %vm254_vm1 = vmmov 0   ;;  %vm72_vm2 = vcmask 523264   ;;  %s331_s1 = inlined_call_operand.vmem [shape: bf16[64,32], index: 1, kind: input, shape index: {}]   ;;  %s332_s0 = inlined_call_operand.vmem [shape: bf16[16,64], index: 0, kind: input, shape index: {}]   ;;  %s333_s3 = inlined_call_operand.vmem [shape: bf16[16,32], index: 3, kind: input, shape index: {}]   ;;  %s334_s2 = inlined_call_operand.vmem [shape: f32[1,32], index: 2, kind: input, shape index: {}]   ;;  %s335_s4 = inlined_call_operand.vmem [shape: f32[1,32], index: 4, kind: input, shape index: {}]   ;;  %s336_s5 = inlined_call_operand.vmem [shape: f32[1,32], index: 5, kind: input, shape index: {}]   ;;  %s337_s6 = inlined_call_operand.vmem [shape: bf16[16,32], index: 6, kind: output, shape index: {}]  }
   0x1   :  { %230 = vmatprep.subr.bf16.mxu0 %v253_v0  ;;  %v244_v1 = vld [vmem:[%s331_s1] sm:$0xff]   ;;  %238 = vmatprep.mubr.msk.bf16.mxu0 %vm254_vm1, %v253_v0  ;;  %29 = vst.msk [vmem:[#allocation2] sm:$0xff] %vm28_vm0, %v253_v0  ;;  %30 = vst.msk [vmem:[#allocation2 + $0x8] sm:$0xff] %vm28_vm0, %v253_v0  ;;  %v245_v2 = vld [vmem:[%s331_s1 + $0x8] sm:$0xff]   ;;  %vm201_vm3 = vcmask 257024  }
   0x2   :  { %231 = vmatpush3.bf16.msra.mxu0 %v244_v1  ;;  %v246_v3 = vld [vmem:[%s331_s1 + $0x10] sm:$0xff]   ;;  %v247_v4 = vld [vmem:[%s331_s1 + $0x18] sm:$0xff]   ;;  %v248_v5 = vld [vmem:[%s332_s0] sm:$0xff]  }
   0x3   :  { %232 = vmatprep.subr.bf16.mxu0 %v253_v0  ;;  %v222_v14 = vld [vmem:[%s333_s3] sm:$0xff]  }
   0x4   :  { %v214_v15 = vld [vmem:[%s334_s2] ss:$0 sm:$0xff]  ;;  %v223_v16 = vunpack.c.l.bf16 %v222_v14  ;;  %v224_v19 = vunpack.c.h.bf16 %v222_v14 }
   0x5   :  { %v215_v48 = vld [vmem:[%s335_s4] ss:$0 sm:$0xff] }
   0x6   :  { %233 = vmatpush3.bf16.msra.mxu0 %v245_v2  ;;  %v216_v50 = vld [vmem:[%s336_s5] ss:$0 sm:$0xff] }
   0x7   :  { %234 = vmatprep.subr.bf16.mxu0 %v253_v0 }
   0x8   :  { %v31_v6 = vld [vmem:[#allocation2] sm:$0xff]  ;;  %v32_v8 = vld [vmem:[#allocation2 + $0x8] sm:$0xff] }
   0xa   :  { %235 = vmatpush3.bf16.msra.mxu0 %v246_v3 }
   0xb   :  { %236 = vmatprep.subr.bf16.mxu0 %v253_v0 }
   0xe   :  { %237 = vmatpush3.bf16.msra.mxu0 %v247_v4 }
  0x11   :  { %239 = vmatmul.mubr.msk.bf16.vlgmr.msra.gmra.mrb[0].mxu0 %vm72_vm2, %v248_v5 }
  0xe4   :  { %v110_v7 = vpop.f32.mrb[0].mxu0 }
  0xe5   :  { %v117_v9 = vadd.f32 %v110_v7, %v31_v6  ;;  %v240_v10 = vpop.f32.mrb[1].mxu0 }
  0xe6   :  { %v113_v11 = vpop.f32.mrb[2].mxu0 }
  0xe7   :  { %120 = vst.msk [vmem:[#allocation2] sm:$0xff] %vm28_vm0, %v117_v9  ;;  %v118_v12 = vadd.f32 %v113_v11, %v32_v8  ;;  %v241_v13 = vpop.f32.mrb[3].mxu0 }
  0xe9   :  { %121 = vst.msk [vmem:[#allocation2 + $0x8] sm:$0xff] %vm28_vm0, %v118_v12 }
  0xee   :  { %v125_v17 = vld [vmem:[#allocation2] sm:$0xff] }
  0xef   :  { %v134_v18 = vadd.f32 %v214_v15, %v125_v17 }
  0xf0   :  { %v126_v20 = vld [vmem:[#allocation2 + $0x8] sm:$0xff] }
  0xf1   :  { %v140_v21 = vadd.f32 %v223_v16, %v134_v18  ;;  %v135_v22 = vadd.f32 %v214_v15, %v126_v20 }
  0xf3   :  { %v142_v23 = vsel %vm28_vm0, %v140_v21, 0.0  ;;  %v151_v24 = vmul.f32 %v140_v21, %v140_v21  ;;  %v141_v25 = vadd.f32 %v224_v19, %v135_v22 }
  0xf4   :  { %143 = vadd.xlane.f32.xlu0 %v142_v23 }
  0xf5   :  { %v153_v26 = vsel %vm28_vm0, %v151_v24, 0.0  ;;  %v152_v27 = vmul.f32 %v141_v25, %v141_v25  ;;  %v145_v28 = vsel %vm28_vm0, %v141_v25, 0.0 }
  0xf6   :  { %154 = vadd.xlane.f32.xlu1 %v153_v26 }
  0xf7   :  { %v156_v29 = vsel %vm28_vm0, %v152_v27, 0.0 }
  0xf8   :  { %146 = vadd.xlane.f32.xlu0 %v145_v28 }
  0xfa   :  { %157 = vadd.xlane.f32.xlu1 %v156_v29 }
 0x181   :  { %v144_v30 = vpop.xlane.xlu0 %143 }
 0x182   :  { %v149_v31 = vmul.f32 0.03125, %v144_v30 }
 0x183   :  { %v155_v32 = vpop.xlane.xlu1 %154 }
 0x184   :  { %v161_v33 = vmul.f32 %v149_v31, %v149_v31  ;;  %v159_v34 = vmul.f32 0.03125, %v155_v32  ;;  %v167_v46 = vsub.f32 %v140_v21, %v149_v31 }
 0x185   :  { %v147_v35 = vpop.xlane.xlu0 %146 }
 0x186   :  { %v163_v36 = vsub.f32 %v159_v34, %v161_v33  ;;  %v150_v37 = vmul.f32 0.03125, %v147_v35 }
 0x187   :  { %v158_v38 = vpop.xlane.xlu1 %157 }
 0x188   :  { %v165_v39 = vmax.f32 %v163_v36, 0.0  ;;  %v162_v40 = vmul.f32 %v150_v37, %v150_v37  ;;  %v160_v41 = vmul.f32 0.03125, %v158_v38  ;;  %v168_v52 = vsub.f32 %v141_v25, %v150_v37 }
 0x18a   :  { %v169_v42 = vadd.f32 1e-05, %v165_v39  ;;  %v164_v43 = vsub.f32 %v160_v41, %v162_v40 }
 0x18c   :  { %249 = vrsqrt.f32 %v169_v42  ;;  %v166_v44 = vmax.f32 %v164_v43, 0.0 }
 0x18e   :  { %v170_v45 = vadd.f32 1e-05, %v166_v44 }
 0x190   :  { %251 = vrsqrt.f32 %v170_v45 }
 0x196   :  { %v250_v47 = vpop.eup %249 }
 0x197   :  { %v173_v49 = vmul.f32 %v250_v47, %v167_v46 }
 0x199   :  { %v182_v51 = vmul.f32 %v215_v48, %v173_v49 }
 0x19a   :  { %v252_v53 = vpop.eup %251 }
 0x19b   :  { %v191_v54 = vadd.f32 %v216_v50, %v182_v51  ;;  %v174_v55 = vmul.f32 %v252_v53, %v168_v52 }
 0x19d   :  { %v219_v56 = vpack.c.bf16 %v191_v54, %v191_v54  ;;  %v183_v57 = vmul.f32 %v215_v48, %v174_v55 }
 0x19f   :  { %202 = vst.msk [vmem:[%s337_s6] sm:$0xf] %vm201_vm3, %v219_v56  ;;  %v192_v58 = vadd.f32 %v216_v50, %v183_v57 }
 0x1a1   :  { %v220_v59 = vpack.c.bf16 %v192_v58, %v192_v58 }
 0x1a3   :  { %203 = vst.msk [vmem:[%s337_s6 + $0x4] sm:$0xf] %vm201_vm3, %v220_v59 }

// kernel: encoder_forward.23
= control target key start
LH: loop header
LB: loop body
LE: loop exit
PB: predicated region body
PF: predicated region fallthrough
CT: control target
= control target key end

     0   :  { %v280_v1 = vmov 0.0   ;;  %vm281_vm0 = vmmov 0   ;;  %vm29_vm1 = vcmask 261120   ;;  %s369_s0 = inlined_call_operand.vmem [shape: bf16[16,64], index: 0, kind: input, shape index: {}]   ;;  %s370_s1 = inlined_call_operand.vmem [shape: bf16[64,32], index: 1, kind: input, shape index: {}]   ;;  %s371_s2 = inlined_call_operand.vmem [shape: f32[1,32], index: 2, kind: input, shape index: {}]   ;;  %s372_s3 = inlined_call_operand.vmem [shape: bf16[16,32], index: 3, kind: input, shape index: {}]   ;;  %s373_s4 = inlined_call_operand.vmem [shape: f32[1,32], index: 4, kind: input, shape index: {}]   ;;  %s374_s5 = inlined_call_operand.vmem [shape: f32[1,32], index: 5, kind: input, shape index: {}]   ;;  %s375_s6 = inlined_call_operand.hbm [shape: f32[16,32], index: 6, kind: output, shape index: {}]  }
   0x1   :  { %v247_v0 = vld [vmem:[%s370_s1] sm:$0xff]   ;;  %230 = vmatprep.subr.bf16.mxu0 %v280_v1  ;;  %v248_v2 = vld [vmem:[%s370_s1 + $0x8] sm:$0xff]   ;;  %238 = vmatprep.mubr.msk.bf16.mxu0 %vm281_vm0, %v280_v1  ;;  %30 = vst.msk [vmem:[#allocation2] sm:$0xff] %vm29_vm1, %v280_v1  ;;  %31 = vst.msk [vmem:[#allocation2 + $0x8] sm:$0xff] %vm29_vm1, %v280_v1 }
   0x2   :  { %231 = vmatpush3.bf16.msra.mxu0 %v247_v0 }
   0x3   :  { %232 = vmatprep.subr.bf16.mxu0 %v280_v1 }
   0x4   :  { %11 = vsyncpa [#allocation4], 0  ;;  %v249_v3 = vld [vmem:[%s370_s1 + $0x10] sm:$0xff]   ;;  %v250_v4 = vld [vmem:[%s370_s1 + $0x18] sm:$0xff]   ;;  %vm73_vm2 = vcmask 523264   ;;  %s282_s11 = smov [#allocation3]  }
   0x5   :  { %v251_v5 = vld [vmem:[%s369_s0] sm:$0xff]   ;;  %s201_s12 = sshll.u32 %s282_s11, 4  ;;  %s202_s12 = int_to_ptr.vmem [resolvable:$true] %s201_s12 }
   0x6   :  { %233 = vmatpush3.bf16.msra.mxu0 %v248_v2  ;;  %v222_v14 = vld [vmem:[%s372_s3] sm:$0xff]   ;;  %p261_p1 = scmp.lt.s32.totalorder %s202_s12, %s202_s12 }
   0x7   :  { %234 = vmatprep.subr.bf16.mxu0 %v280_v1  ;;  %v218_v15 = vld [vmem:[%s371_s2] ss:$0 sm:$0xff]  ;;  %v223_v16 = vunpack.c.l.bf16 %v222_v14  ;;  %v224_v19 = vunpack.c.h.bf16 %v222_v14 }
   0x8   :  { %v32_v6 = vld [vmem:[#allocation2] sm:$0xff]  ;;  %v33_v8 = vld [vmem:[#allocation2 + $0x8] sm:$0xff] }
   0x9   :  { %v219_v48 = vld [vmem:[%s373_s4] ss:$0 sm:$0xff]  ;;  %s256_s4 = scalar_lea.vmem %s202_s12, 256 }
   0xa   :  { %235 = vmatpush3.bf16.msra.mxu0 %v249_v3  ;;  %v220_v50 = vld [vmem:[%s374_s5] ss:$0 sm:$0xff]  ;;  %p257_p0 = scmp.ne.s32.totalorder %s202_s12, %s256_s4  ;;  %p262_p2 = scmp.lt.s32.totalorder %s256_s4, %s256_s4 }
   0xb   :  { %236 = vmatprep.subr.bf16.mxu0 %v280_v1 }
   0xc   :  { %p263_p3 = por %p262_p2, %p261_p1 }
   0xe   :  { %237 = vmatpush3.bf16.msra.mxu0 %v250_v4  ;;  %p264_p4 = pnand %p263_p3, %p257_p0 }
  0x11   :  { %239 = vmatmul.mubr.msk.bf16.vlgmr.msra.gmra.mrb[0].mxu0 %vm73_vm2, %v251_v5 }
  0xe4   :  { %v111_v7 = vpop.f32.mrb[0].mxu0 }
  0xe5   :  { %v118_v9 = vadd.f32 %v111_v7, %v32_v6  ;;  %v240_v10 = vpop.f32.mrb[1].mxu0 }
  0xe6   :  { %v114_v11 = vpop.f32.mrb[2].mxu0 }
  0xe7   :  { %121 = vst.msk [vmem:[#allocation2] sm:$0xff] %vm29_vm1, %v118_v9  ;;  %v119_v12 = vadd.f32 %v114_v11, %v33_v8  ;;  %v241_v13 = vpop.f32.mrb[3].mxu0 }
  0xe9   :  { %122 = vst.msk [vmem:[#allocation2 + $0x8] sm:$0xff] %vm29_vm1, %v119_v12 }
  0xee   :  { %v126_v17 = vld [vmem:[#allocation2] sm:$0xff] }
  0xef   :  { %v135_v18 = vadd.f32 %v218_v15, %v126_v17 }
  0xf0   :  { %v127_v20 = vld [vmem:[#allocation2 + $0x8] sm:$0xff] }
  0xf1   :  { %v141_v21 = vadd.f32 %v223_v16, %v135_v18  ;;  %v136_v22 = vadd.f32 %v218_v15, %v127_v20 }
  0xf3   :  { %v143_v23 = vsel %vm29_vm1, %v141_v21, 0.0  ;;  %v152_v24 = vmul.f32 %v141_v21, %v141_v21  ;;  %v142_v25 = vadd.f32 %v224_v19, %v136_v22 }
  0xf4   :  { %144 = vadd.xlane.f32.xlu0 %v143_v23 }
  0xf5   :  { %v154_v26 = vsel %vm29_vm1, %v152_v24, 0.0  ;;  %v153_v27 = vmul.f32 %v142_v25, %v142_v25  ;;  %v146_v28 = vsel %vm29_vm1, %v142_v25, 0.0 }
  0xf6   :  { %155 = vadd.xlane.f32.xlu1 %v154_v26 }
  0xf7   :  { %v157_v29 = vsel %vm29_vm1, %v153_v27, 0.0 }
  0xf8   :  { %147 = vadd.xlane.f32.xlu0 %v146_v28 }
  0xfa   :  { %158 = vadd.xlane.f32.xlu1 %v157_v29 }
 0x181   :  { %v145_v30 = vpop.xlane.xlu0 %144 }
 0x182   :  { %v150_v31 = vmul.f32 0.03125, %v145_v30 }
 0x183   :  { %v156_v32 = vpop.xlane.xlu1 %155 }
 0x184   :  { %v162_v33 = vmul.f32 %v150_v31, %v150_v31  ;;  %v160_v34 = vmul.f32 0.03125, %v156_v32  ;;  %v168_v46 = vsub.f32 %v141_v21, %v150_v31 }
 0x185   :  { %v148_v35 = vpop.xlane.xlu0 %147 }
 0x186   :  { %v164_v36 = vsub.f32 %v160_v34, %v162_v33  ;;  %v151_v37 = vmul.f32 0.03125, %v148_v35 }
 0x187   :  { %v159_v38 = vpop.xlane.xlu1 %158 }
 0x188   :  { %v166_v39 = vmax.f32 %v164_v36, 0.0  ;;  %v163_v40 = vmul.f32 %v151_v37, %v151_v37  ;;  %v161_v41 = vmul.f32 0.03125, %v159_v38  ;;  %v169_v51 = vsub.f32 %v142_v25, %v151_v37 }
 0x18a   :  { %v170_v42 = vadd.f32 1e-05, %v166_v39  ;;  %v165_v43 = vsub.f32 %v161_v41, %v163_v40 }
 0x18c   :  { %252 = vrsqrt.f32 %v170_v42  ;;  %v167_v44 = vmax.f32 %v165_v43, 0.0 }
 0x18e   :  { %v171_v45 = vadd.f32 1e-05, %v167_v44 }
 0x190   :  { %254 = vrsqrt.f32 %v171_v45 }
 0x196   :  { %v253_v47 = vpop.eup %252 }
 0x197   :  { %v174_v49 = vmul.f32 %v253_v47, %v168_v46 }
 0x199   :  { %v183_v52 = vmul.f32 %v219_v48, %v174_v49 }
 0x19a   :  { %v255_v53 = vpop.eup %254 }
 0x19b   :  { %v175_v54 = vmul.f32 %v255_v53, %v169_v51  ;;  %v192_v55 = vadd.f32 %v220_v50, %v183_v52 }
 0x19d   :  { %v184_v56 = vmul.f32 %v219_v48, %v175_v54  ;;  %194 = vst.msk [vmem:[#allocation3] sm:$0xff] %vm29_vm1, %v192_v55 }
 0x19f   :  { %v193_v57 = vadd.f32 %v220_v50, %v184_v56 }
 0x1a1   :  { %195 = vst.msk [vmem:[#allocation3 + $0x8] sm:$0xff] %vm29_vm1, %v193_v57 }
 0x1a2   :  { %267 = shalt.err (!%p264_p4)
}
 0x1a3   :  { %s268_s14 = scalar_lea.hbm %s375_s6, 256 }
 0x1a4   :  { %p269_p5 = scmp.ne.s32.totalorder %s375_s6, %s268_s14  ;;  %p272_p6 = scmp.lt.u32.totalorder %s268_s14, %s375_s6 }
 0x1a6   :  { %p274_p7 = pnand %p272_p6, %p269_p5 }
 0x1a8   :  { %277 = shalt.err (!%p274_p7)
}
 0x1a9   :  { %s283_s19 = smov 128   ;;  %s284_s20 = smov 8  }
 0x1aa   :  { %207 = dma.vmem_to_hbm [thread:$0]  %s202_s12, 256, %s375_s6, [#allocation4], %s283_s19, %s283_s19, %s284_s20  }
 0x1ab   :  { %278 = dma.done.wait [#allocation4], 256  }
 0x1ac   :  { %279 = vsyncadd [#allocation4], 4294967040 }
 0x1ad   :  { %211 = vsyncpa [#allocation4], 1 }

</bundles_post_ra>
